<compile_context>
chip_gen: v5e
topology: v5e:2x2
jax: 0.10.0
libtpu: 0.0.40
codegen_flags: <defaults>
</compile_context>

<pallas_src>
import functools

import jax
import jax.numpy as jnp
from jax import lax
from jax.experimental import pallas as pl
from jax.experimental.pallas import tpu as pltpu


# ----------------------------- Pallas kernel ------------------------------- #
def _encdec_lstm_kernel(
    xg_ref,       # (Tx, B, 4H)  encoder pre-activations  x@W_ih^T + b (time-major)
    yg_ref,       # (Ty, B, 4H)  decoder pre-activations  y@W_ih^T + b (time-major)
    w_hh_e_ref,   # (H, 4H)      encoder W_hh^T
    w_hh_d_ref,   # (H, 4H)      decoder W_hh^T
    w_end_ref,    # (1, H)       fc_end weight row
    b_end_ref,    # (1, 1)       fc_end bias
    out_ref,      # (B, Ty)      prediction, batch-major
):
    Tx, B, _ = xg_ref.shape
    Ty = yg_ref.shape[0]
    H = w_hh_e_ref.shape[0]

    w_hh_e = w_hh_e_ref[...]                              # (H, 4H)
    w_hh_d = w_hh_d_ref[...]                              # (H, 4H)
    # Hoist the fc_end-row broadcast out of the loop (no CSE of broadcasts).
    w_end_b = jnp.broadcast_to(w_end_ref[...], (B, H))    # (B, H)

    def cell(pre, h, c, w_hh, *, first):
        # pre: (B, 4H) precomputed input projection incl. fused biases.
        # `first=True` skips the recurrent matmul because h == 0 exactly.
        if first:
            gates = pre
        else:
            gates = pre + jnp.dot(h, w_hh, preferred_element_type=jnp.float32)
        s = jax.nn.sigmoid(gates)          # one full-vreg EUP push
        t = jnp.tanh(gates)                # one full-vreg EUP push
        i_g = s[:, 0 * H:1 * H]
        f_g = s[:, 1 * H:2 * H]
        g_g = t[:, 2 * H:3 * H]
        o_g = s[:, 3 * H:4 * H]
        c_new = f_g * c + i_g * g_g
        h_new = o_g * jnp.tanh(c_new)
        return h_new, c_new

    zeros = jnp.zeros((B, H), jnp.float32)

    # ---------------- encoder: only the final cell state is kept ----------- #
    h, c = zeros, zeros
    for t in range(Tx):                    # static unroll (Tx is compile-time)
        h, c = cell(xg_ref[t], h, c, w_hh_e, first=(t == 0))

    # ----------- decoder: h0 = 0, c0 = encoder c_n; fused fc_end ----------- #
    h = zeros
    col_idx = lax.broadcasted_iota(jnp.int32, (B, Ty), dimension=1)
    pred = jnp.zeros((B, Ty), jnp.float32)
    for t in range(Ty):                    # static unroll (Ty is compile-time)
        h, c = cell(yg_ref[t], h, c, w_hh_d, first=(t == 0))
        # fc_end fused on VPU/XLU: elementwise mul + 32-lane reduce -> (B, 1).
        p_t = jnp.sum(h * w_end_b, axis=-1, keepdims=True)
        pred = jnp.where(col_idx == t, p_t, pred)

    out_ref[...] = pred + b_end_ref[...]   # single lane-dense (B, Ty) store


# ------------------------------- wrapper ------------------------------------ #
@functools.partial(jax.jit, static_argnames=("hidden_size",))
def encdec_occ_lstm_forward(x, y_features, params, hidden_size):
    """x: (B, Tx, Dx), y_features: (B, Ty, Dy). Returns pred: (B, Ty)."""
    B, Tx, Dx = x.shape
    _, Ty, Dy = y_features.shape
    H = hidden_size

    x = x.astype(jnp.float32)
    yf = y_features.astype(jnp.float32)

    # Hoisted input projections: one batched (T*B, D)x(D, 4H) matmul per LSTM,
    # outside the serial recurrence.  Time-major result, fused PyTorch biases.
    b_e = params["enc_b_ih"] + params["enc_b_hh"]                  # (4H,)
    b_d = params["dec_b_ih"] + params["dec_b_hh"]                  # (4H,)
    xg = jnp.einsum("btd,gd->tbg", x, params["enc_w_ih"]) + b_e    # (Tx, B, 4H)
    yg = jnp.einsum("btd,gd->tbg", yf, params["dec_w_ih"]) + b_d   # (Ty, B, 4H)

    w_hh_e_T = params["enc_w_hh"].T                                # (H, 4H)
    w_hh_d_T = params["dec_w_hh"].T                                # (H, 4H)
    w_end_row = params["end_w"].reshape(1, H)                      # (1, H)
    b_end = params["end_b"].reshape(1, 1)                          # (1, 1)

    vmem = pl.BlockSpec(memory_space=pltpu.MemorySpace.VMEM)
    # No grid: all operands fit trivially in VMEM at these shapes.
    # NOTE: callers with batching freedom should pack B up to a multiple of 8
    # (f32 sublanes) -- per-step cost is identical, so it is free extra work.
    out = pl.pallas_call(
        _encdec_lstm_kernel,
        out_shape=jax.ShapeDtypeStruct((B, Ty), jnp.float32),
        in_specs=[vmem] * 6,
        out_specs=vmem,
    )(xg, yg, w_hh_e_T, w_hh_d_T, w_end_row, b_end)
    return out                                                     # (B, Ty)


# ------------------------- pure-JAX reference ------------------------------- #
def _lstm_ref(xs, h0, c0, w_ih, w_hh, b_ih, b_hh):
    def step(carry, x_t):
        h, c = carry
        gates = x_t @ w_ih.T + h @ w_hh.T + b_ih + b_hh
        i, f, g, o = jnp.split(gates, 4, axis=-1)
        i = jax.nn.sigmoid(i)
        f = jax.nn.sigmoid(f)
        g = jnp.tanh(g)
        o = jax.nn.sigmoid(o)
        c = f * c + i * g
        h = o * jnp.tanh(c)
        return (h, c), h

    (h, c), hs = lax.scan(step, (h0, c0), jnp.swapaxes(xs, 0, 1))
    return hs, h, c  # hs: (T, B, H)


def _forward_ref(x, y_features, params, H):
    B = x.shape[0]
    z = jnp.zeros((B, H), jnp.float32)
    _, _, c_n = _lstm_ref(x, z, z, params["enc_w_ih"], params["enc_w_hh"],
                          params["enc_b_ih"], params["enc_b_hh"])
    hs, _, _ = _lstm_ref(y_features, z, c_n, params["dec_w_ih"],
                         params["dec_w_hh"], params["dec_b_ih"],
                         params["dec_b_hh"])
    pred = hs @ params["end_w"].T + params["end_b"]      # (Ty, B, 1)
    return jnp.swapaxes(pred[..., 0], 0, 1)              # (B, Ty)


# --------------------------------- main ------------------------------------- #
def _init_params(key, Dx, Dy, H, y_size=1):
    scale = 1.0 / jnp.sqrt(H)

    def u(k, shape):
        return jax.random.uniform(k, shape, jnp.float32, -scale, scale)

    ks = jax.random.split(key, 10)
    return {
        "enc_w_ih": u(ks[0], (4 * H, Dx)),
        "enc_w_hh": u(ks[1], (4 * H, H)),
        "enc_b_ih": u(ks[2], (4 * H,)),
        "enc_b_hh": u(ks[3], (4 * H,)),
        "dec_w_ih": u(ks[4], (4 * H, Dy)),
        "dec_w_hh": u(ks[5], (4 * H, H)),
        "dec_b_ih": u(ks[6], (4 * H,)),
        "dec_b_hh": u(ks[7], (4 * H,)),
        "end_w": u(ks[8], (y_size, H)),
        "end_b": u(ks[9], (y_size,)),
    }


if __name__ == "__main__":
    B, Tx, Ty = 2, 8, 8
    Dx, Dy, H = 4, 3, 32   # x_size, y_features_size, hidden_size[0]

    key = jax.random.PRNGKey(0)
    k_x, k_y, k_p = jax.random.split(key, 3)
    x = jax.random.normal(k_x, (B, Tx, Dx), jnp.float32)
    y_features = jax.random.normal(k_y, (B, Ty, Dy), jnp.float32)
    params = _init_params(k_p, Dx, Dy, H)

    pred = encdec_occ_lstm_forward(x, y_features, params, hidden_size=H)
    pred = jax.block_until_ready(pred)

    ref = _forward_ref(x, y_features, params, H)
    assert pred.shape == (B, Ty)
    err = float(jnp.max(jnp.abs(pred - ref)))
    assert jnp.allclose(pred, ref, atol=1e-4, rtol=1e-4), f"mismatch: max err {err}"

    print("KERNEL_OK")
</pallas_src>

<mosaic_0001>
module attributes {stable_mosaic.version = 11 : i64} {
  func.func @_encdec_lstm_kernel(%arg0: memref<8x2x128xf32, #tpu.memory_space<vmem>>, %arg1: memref<8x2x128xf32, #tpu.memory_space<vmem>>, %arg2: memref<32x128xf32, #tpu.memory_space<vmem>>, %arg3: memref<32x128xf32, #tpu.memory_space<vmem>>, %arg4: memref<1x32xf32, #tpu.memory_space<vmem>>, %arg5: memref<1x1xf32, #tpu.memory_space<vmem>>, %arg6: memref<2x8xf32, #tpu.memory_space<vmem>>) attributes {dimension_semantics = [], scalar_prefetch = 0 : i64, scratch_operands = 0 : i64, tpu.core_type = #tpu.core_type<tc>} {
    %c0 = arith.constant 0 : index
    %c0_0 = arith.constant 0 : index
    %0 = vector.load %arg2[%c0, %c0_0] : memref<32x128xf32, #tpu.memory_space<vmem>>, vector<32x128xf32>
    %c0_1 = arith.constant 0 : index
    %c0_2 = arith.constant 0 : index
    %1 = vector.load %arg3[%c0_1, %c0_2] : memref<32x128xf32, #tpu.memory_space<vmem>>, vector<32x128xf32>
    %c0_3 = arith.constant 0 : index
    %c0_4 = arith.constant 0 : index
    %2 = vector.load %arg4[%c0_3, %c0_4] : memref<1x32xf32, #tpu.memory_space<vmem>>, vector<1x32xf32>
    %3 = vector.shape_cast %2 : vector<1x32xf32> to vector<1x32xf32>
    %4 = vector.broadcast %3 : vector<1x32xf32> to vector<2x32xf32>
    %cst = arith.constant 0.000000e+00 : f32
    %5 = vector.broadcast %cst : f32 to vector<2x32xf32>
    %c0_5 = arith.constant 0 : index
    %c0_6 = arith.constant 0 : index
    %c0_7 = arith.constant 0 : index
    %6 = vector.load %arg0[%c0_5, %c0_6, %c0_7] : memref<8x2x128xf32, #tpu.memory_space<vmem>>, vector<1x2x128xf32>
    %7 = vector.shape_cast %6 : vector<1x2x128xf32> to vector<2x128xf32>
    %8 = arith.negf %7 : vector<2x128xf32>
    %9 = math.exp %8 : vector<2x128xf32>
    %cst_8 = arith.constant 1.000000e+00 : f32
    %10 = vector.broadcast %cst_8 : f32 to vector<2x128xf32>
    %11 = arith.addf %10, %9 : vector<2x128xf32>
    %12 = arith.divf %10, %11 : vector<2x128xf32>
    %13 = math.tanh %7 : vector<2x128xf32>
    %14 = vector.extract_strided_slice %12 {offsets = [0, 0], sizes = [2, 32], strides = [1, 1]} : vector<2x128xf32> to vector<2x32xf32>
    %15 = vector.extract_strided_slice %12 {offsets = [0, 32], sizes = [2, 32], strides = [1, 1]} : vector<2x128xf32> to vector<2x32xf32>
    %16 = vector.extract_strided_slice %13 {offsets = [0, 64], sizes = [2, 32], strides = [1, 1]} : vector<2x128xf32> to vector<2x32xf32>
    %17 = vector.extract_strided_slice %12 {offsets = [0, 96], sizes = [2, 32], strides = [1, 1]} : vector<2x128xf32> to vector<2x32xf32>
    %18 = arith.mulf %15, %5 : vector<2x32xf32>
    %19 = arith.mulf %14, %16 : vector<2x32xf32>
    %20 = arith.addf %18, %19 : vector<2x32xf32>
    %21 = math.tanh %20 : vector<2x32xf32>
    %22 = arith.mulf %17, %21 : vector<2x32xf32>
    %c1 = arith.constant 1 : index
    %c0_9 = arith.constant 0 : index
    %c0_10 = arith.constant 0 : index
    %23 = vector.load %arg0[%c1, %c0_9, %c0_10] : memref<8x2x128xf32, #tpu.memory_space<vmem>>, vector<1x2x128xf32>
    %24 = vector.shape_cast %23 : vector<1x2x128xf32> to vector<2x128xf32>
    %cst_11 = arith.constant dense<0.000000e+00> : vector<2x128xf32>
    %25 = tpu.matmul %22, %0, %cst_11 {dimension_numbers = #tpu.dot_dimension_numbers<[1], [0], [0], [1], [0, 0, 1, 1], [], []>} : vector<2x32xf32>, vector<32x128xf32>, vector<2x128xf32> -> vector<2x128xf32>
    %26 = arith.addf %24, %25 : vector<2x128xf32>
    %27 = arith.negf %26 : vector<2x128xf32>
    %28 = math.exp %27 : vector<2x128xf32>
    %cst_12 = arith.constant 1.000000e+00 : f32
    %29 = vector.broadcast %cst_12 : f32 to vector<2x128xf32>
    %30 = arith.addf %29, %28 : vector<2x128xf32>
    %31 = arith.divf %29, %30 : vector<2x128xf32>
    %32 = math.tanh %26 : vector<2x128xf32>
    %33 = vector.extract_strided_slice %31 {offsets = [0, 0], sizes = [2, 32], strides = [1, 1]} : vector<2x128xf32> to vector<2x32xf32>
    %34 = vector.extract_strided_slice %31 {offsets = [0, 32], sizes = [2, 32], strides = [1, 1]} : vector<2x128xf32> to vector<2x32xf32>
    %35 = vector.extract_strided_slice %32 {offsets = [0, 64], sizes = [2, 32], strides = [1, 1]} : vector<2x128xf32> to vector<2x32xf32>
    %36 = vector.extract_strided_slice %31 {offsets = [0, 96], sizes = [2, 32], strides = [1, 1]} : vector<2x128xf32> to vector<2x32xf32>
    %37 = arith.mulf %34, %20 : vector<2x32xf32>
    %38 = arith.mulf %33, %35 : vector<2x32xf32>
    %39 = arith.addf %37, %38 : vector<2x32xf32>
    %40 = math.tanh %39 : vector<2x32xf32>
    %41 = arith.mulf %36, %40 : vector<2x32xf32>
    %c2 = arith.constant 2 : index
    %c0_13 = arith.constant 0 : index
    %c0_14 = arith.constant 0 : index
    %42 = vector.load %arg0[%c2, %c0_13, %c0_14] : memref<8x2x128xf32, #tpu.memory_space<vmem>>, vector<1x2x128xf32>
    %43 = vector.shape_cast %42 : vector<1x2x128xf32> to vector<2x128xf32>
    %cst_15 = arith.constant dense<0.000000e+00> : vector<2x128xf32>
    %44 = tpu.matmul %41, %0, %cst_15 {dimension_numbers = #tpu.dot_dimension_numbers<[1], [0], [0], [1], [0, 0, 1, 1], [], []>} : vector<2x32xf32>, vector<32x128xf32>, vector<2x128xf32> -> vector<2x128xf32>
    %45 = arith.addf %43, %44 : vector<2x128xf32>
    %46 = arith.negf %45 : vector<2x128xf32>
    %47 = math.exp %46 : vector<2x128xf32>
    %cst_16 = arith.constant 1.000000e+00 : f32
    %48 = vector.broadcast %cst_16 : f32 to vector<2x128xf32>
    %49 = arith.addf %48, %47 : vector<2x128xf32>
    %50 = arith.divf %48, %49 : vector<2x128xf32>
    %51 = math.tanh %45 : vector<2x128xf32>
    %52 = vector.extract_strided_slice %50 {offsets = [0, 0], sizes = [2, 32], strides = [1, 1]} : vector<2x128xf32> to vector<2x32xf32>
    %53 = vector.extract_strided_slice %50 {offsets = [0, 32], sizes = [2, 32], strides = [1, 1]} : vector<2x128xf32> to vector<2x32xf32>
    %54 = vector.extract_strided_slice %51 {offsets = [0, 64], sizes = [2, 32], strides = [1, 1]} : vector<2x128xf32> to vector<2x32xf32>
    %55 = vector.extract_strided_slice %50 {offsets = [0, 96], sizes = [2, 32], strides = [1, 1]} : vector<2x128xf32> to vector<2x32xf32>
    %56 = arith.mulf %53, %39 : vector<2x32xf32>
    %57 = arith.mulf %52, %54 : vector<2x32xf32>
    %58 = arith.addf %56, %57 : vector<2x32xf32>
    %59 = math.tanh %58 : vector<2x32xf32>
    %60 = arith.mulf %55, %59 : vector<2x32xf32>
    %c3 = arith.constant 3 : index
    %c0_17 = arith.constant 0 : index
    %c0_18 = arith.constant 0 : index
    %61 = vector.load %arg0[%c3, %c0_17, %c0_18] : memref<8x2x128xf32, #tpu.memory_space<vmem>>, vector<1x2x128xf32>
    %62 = vector.shape_cast %61 : vector<1x2x128xf32> to vector<2x128xf32>
    %cst_19 = arith.constant dense<0.000000e+00> : vector<2x128xf32>
    %63 = tpu.matmul %60, %0, %cst_19 {dimension_numbers = #tpu.dot_dimension_numbers<[1], [0], [0], [1], [0, 0, 1, 1], [], []>} : vector<2x32xf32>, vector<32x128xf32>, vector<2x128xf32> -> vector<2x128xf32>
    %64 = arith.addf %62, %63 : vector<2x128xf32>
    %65 = arith.negf %64 : vector<2x128xf32>
    %66 = math.exp %65 : vector<2x128xf32>
    %cst_20 = arith.constant 1.000000e+00 : f32
    %67 = vector.broadcast %cst_20 : f32 to vector<2x128xf32>
    %68 = arith.addf %67, %66 : vector<2x128xf32>
    %69 = arith.divf %67, %68 : vector<2x128xf32>
    %70 = math.tanh %64 : vector<2x128xf32>
    %71 = vector.extract_strided_slice %69 {offsets = [0, 0], sizes = [2, 32], strides = [1, 1]} : vector<2x128xf32> to vector<2x32xf32>
    %72 = vector.extract_strided_slice %69 {offsets = [0, 32], sizes = [2, 32], strides = [1, 1]} : vector<2x128xf32> to vector<2x32xf32>
    %73 = vector.extract_strided_slice %70 {offsets = [0, 64], sizes = [2, 32], strides = [1, 1]} : vector<2x128xf32> to vector<2x32xf32>
    %74 = vector.extract_strided_slice %69 {offsets = [0, 96], sizes = [2, 32], strides = [1, 1]} : vector<2x128xf32> to vector<2x32xf32>
    %75 = arith.mulf %72, %58 : vector<2x32xf32>
    %76 = arith.mulf %71, %73 : vector<2x32xf32>
    %77 = arith.addf %75, %76 : vector<2x32xf32>
    %78 = math.tanh %77 : vector<2x32xf32>
    %79 = arith.mulf %74, %78 : vector<2x32xf32>
    %c4 = arith.constant 4 : index
    %c0_21 = arith.constant 0 : index
    %c0_22 = arith.constant 0 : index
    %80 = vector.load %arg0[%c4, %c0_21, %c0_22] : memref<8x2x128xf32, #tpu.memory_space<vmem>>, vector<1x2x128xf32>
    %81 = vector.shape_cast %80 : vector<1x2x128xf32> to vector<2x128xf32>
    %cst_23 = arith.constant dense<0.000000e+00> : vector<2x128xf32>
    %82 = tpu.matmul %79, %0, %cst_23 {dimension_numbers = #tpu.dot_dimension_numbers<[1], [0], [0], [1], [0, 0, 1, 1], [], []>} : vector<2x32xf32>, vector<32x128xf32>, vector<2x128xf32> -> vector<2x128xf32>
    %83 = arith.addf %81, %82 : vector<2x128xf32>
    %84 = arith.negf %83 : vector<2x128xf32>
    %85 = math.exp %84 : vector<2x128xf32>
    %cst_24 = arith.constant 1.000000e+00 : f32
    %86 = vector.broadcast %cst_24 : f32 to vector<2x128xf32>
    %87 = arith.addf %86, %85 : vector<2x128xf32>
    %88 = arith.divf %86, %87 : vector<2x128xf32>
    %89 = math.tanh %83 : vector<2x128xf32>
    %90 = vector.extract_strided_slice %88 {offsets = [0, 0], sizes = [2, 32], strides = [1, 1]} : vector<2x128xf32> to vector<2x32xf32>
    %91 = vector.extract_strided_slice %88 {offsets = [0, 32], sizes = [2, 32], strides = [1, 1]} : vector<2x128xf32> to vector<2x32xf32>
    %92 = vector.extract_strided_slice %89 {offsets = [0, 64], sizes = [2, 32], strides = [1, 1]} : vector<2x128xf32> to vector<2x32xf32>
    %93 = vector.extract_strided_slice %88 {offsets = [0, 96], sizes = [2, 32], strides = [1, 1]} : vector<2x128xf32> to vector<2x32xf32>
    %94 = arith.mulf %91, %77 : vector<2x32xf32>
    %95 = arith.mulf %90, %92 : vector<2x32xf32>
    %96 = arith.addf %94, %95 : vector<2x32xf32>
    %97 = math.tanh %96 : vector<2x32xf32>
    %98 = arith.mulf %93, %97 : vector<2x32xf32>
    %c5 = arith.constant 5 : index
    %c0_25 = arith.constant 0 : index
    %c0_26 = arith.constant 0 : index
    %99 = vector.load %arg0[%c5, %c0_25, %c0_26] : memref<8x2x128xf32, #tpu.memory_space<vmem>>, vector<1x2x128xf32>
    %100 = vector.shape_cast %99 : vector<1x2x128xf32> to vector<2x128xf32>
    %cst_27 = arith.constant dense<0.000000e+00> : vector<2x128xf32>
    %101 = tpu.matmul %98, %0, %cst_27 {dimension_numbers = #tpu.dot_dimension_numbers<[1], [0], [0], [1], [0, 0, 1, 1], [], []>} : vector<2x32xf32>, vector<32x128xf32>, vector<2x128xf32> -> vector<2x128xf32>
    %102 = arith.addf %100, %101 : vector<2x128xf32>
    %103 = arith.negf %102 : vector<2x128xf32>
    %104 = math.exp %103 : vector<2x128xf32>
    %cst_28 = arith.constant 1.000000e+00 : f32
    %105 = vector.broadcast %cst_28 : f32 to vector<2x128xf32>
    %106 = arith.addf %105, %104 : vector<2x128xf32>
    %107 = arith.divf %105, %106 : vector<2x128xf32>
    %108 = math.tanh %102 : vector<2x128xf32>
    %109 = vector.extract_strided_slice %107 {offsets = [0, 0], sizes = [2, 32], strides = [1, 1]} : vector<2x128xf32> to vector<2x32xf32>
    %110 = vector.extract_strided_slice %107 {offsets = [0, 32], sizes = [2, 32], strides = [1, 1]} : vector<2x128xf32> to vector<2x32xf32>
    %111 = vector.extract_strided_slice %108 {offsets = [0, 64], sizes = [2, 32], strides = [1, 1]} : vector<2x128xf32> to vector<2x32xf32>
    %112 = vector.extract_strided_slice %107 {offsets = [0, 96], sizes = [2, 32], strides = [1, 1]} : vector<2x128xf32> to vector<2x32xf32>
    %113 = arith.mulf %110, %96 : vector<2x32xf32>
    %114 = arith.mulf %109, %111 : vector<2x32xf32>
    %115 = arith.addf %113, %114 : vector<2x32xf32>
    %116 = math.tanh %115 : vector<2x32xf32>
    %117 = arith.mulf %112, %116 : vector<2x32xf32>
    %c6 = arith.constant 6 : index
    %c0_29 = arith.constant 0 : index
    %c0_30 = arith.constant 0 : index
    %118 = vector.load %arg0[%c6, %c0_29, %c0_30] : memref<8x2x128xf32, #tpu.memory_space<vmem>>, vector<1x2x128xf32>
    %119 = vector.shape_cast %118 : vector<1x2x128xf32> to vector<2x128xf32>
    %cst_31 = arith.constant dense<0.000000e+00> : vector<2x128xf32>
    %120 = tpu.matmul %117, %0, %cst_31 {dimension_numbers = #tpu.dot_dimension_numbers<[1], [0], [0], [1], [0, 0, 1, 1], [], []>} : vector<2x32xf32>, vector<32x128xf32>, vector<2x128xf32> -> vector<2x128xf32>
    %121 = arith.addf %119, %120 : vector<2x128xf32>
    %122 = arith.negf %121 : vector<2x128xf32>
    %123 = math.exp %122 : vector<2x128xf32>
    %cst_32 = arith.constant 1.000000e+00 : f32
    %124 = vector.broadcast %cst_32 : f32 to vector<2x128xf32>
    %125 = arith.addf %124, %123 : vector<2x128xf32>
    %126 = arith.divf %124, %125 : vector<2x128xf32>
    %127 = math.tanh %121 : vector<2x128xf32>
    %128 = vector.extract_strided_slice %126 {offsets = [0, 0], sizes = [2, 32], strides = [1, 1]} : vector<2x128xf32> to vector<2x32xf32>
    %129 = vector.extract_strided_slice %126 {offsets = [0, 32], sizes = [2, 32], strides = [1, 1]} : vector<2x128xf32> to vector<2x32xf32>
    %130 = vector.extract_strided_slice %127 {offsets = [0, 64], sizes = [2, 32], strides = [1, 1]} : vector<2x128xf32> to vector<2x32xf32>
    %131 = vector.extract_strided_slice %126 {offsets = [0, 96], sizes = [2, 32], strides = [1, 1]} : vector<2x128xf32> to vector<2x32xf32>
    %132 = arith.mulf %129, %115 : vector<2x32xf32>
    %133 = arith.mulf %128, %130 : vector<2x32xf32>
    %134 = arith.addf %132, %133 : vector<2x32xf32>
    %135 = math.tanh %134 : vector<2x32xf32>
    %136 = arith.mulf %131, %135 : vector<2x32xf32>
    %c7 = arith.constant 7 : index
    %c0_33 = arith.constant 0 : index
    %c0_34 = arith.constant 0 : index
    %137 = vector.load %arg0[%c7, %c0_33, %c0_34] : memref<8x2x128xf32, #tpu.memory_space<vmem>>, vector<1x2x128xf32>
    %138 = vector.shape_cast %137 : vector<1x2x128xf32> to vector<2x128xf32>
    %cst_35 = arith.constant dense<0.000000e+00> : vector<2x128xf32>
    %139 = tpu.matmul %136, %0, %cst_35 {dimension_numbers = #tpu.dot_dimension_numbers<[1], [0], [0], [1], [0, 0, 1, 1], [], []>} : vector<2x32xf32>, vector<32x128xf32>, vector<2x128xf32> -> vector<2x128xf32>
    %140 = arith.addf %138, %139 : vector<2x128xf32>
    %141 = arith.negf %140 : vector<2x128xf32>
    %142 = math.exp %141 : vector<2x128xf32>
    %cst_36 = arith.constant 1.000000e+00 : f32
    %143 = vector.broadcast %cst_36 : f32 to vector<2x128xf32>
    %144 = arith.addf %143, %142 : vector<2x128xf32>
    %145 = arith.divf %143, %144 : vector<2x128xf32>
    %146 = math.tanh %140 : vector<2x128xf32>
    %147 = vector.extract_strided_slice %145 {offsets = [0, 0], sizes = [2, 32], strides = [1, 1]} : vector<2x128xf32> to vector<2x32xf32>
    %148 = vector.extract_strided_slice %145 {offsets = [0, 32], sizes = [2, 32], strides = [1, 1]} : vector<2x128xf32> to vector<2x32xf32>
    %149 = vector.extract_strided_slice %146 {offsets = [0, 64], sizes = [2, 32], strides = [1, 1]} : vector<2x128xf32> to vector<2x32xf32>
    %150 = arith.mulf %148, %134 : vector<2x32xf32>
    %151 = arith.mulf %147, %149 : vector<2x32xf32>
    %152 = arith.addf %150, %151 : vector<2x32xf32>
    %153 = tpu.iota {dimensions = array<i32: 1>} : vector<2x8xi32>
    %cst_37 = arith.constant 0.000000e+00 : f32
    %154 = vector.broadcast %cst_37 : f32 to vector<2x8xf32>
    %c0_38 = arith.constant 0 : index
    %c0_39 = arith.constant 0 : index
    %c0_40 = arith.constant 0 : index
    %155 = vector.load %arg1[%c0_38, %c0_39, %c0_40] : memref<8x2x128xf32, #tpu.memory_space<vmem>>, vector<1x2x128xf32>
    %156 = vector.shape_cast %155 : vector<1x2x128xf32> to vector<2x128xf32>
    %157 = arith.negf %156 : vector<2x128xf32>
    %158 = math.exp %157 : vector<2x128xf32>
    %cst_41 = arith.constant 1.000000e+00 : f32
    %159 = vector.broadcast %cst_41 : f32 to vector<2x128xf32>
    %160 = arith.addf %159, %158 : vector<2x128xf32>
    %161 = arith.divf %159, %160 : vector<2x128xf32>
    %162 = math.tanh %156 : vector<2x128xf32>
    %163 = vector.extract_strided_slice %161 {offsets = [0, 0], sizes = [2, 32], strides = [1, 1]} : vector<2x128xf32> to vector<2x32xf32>
    %164 = vector.extract_strided_slice %161 {offsets = [0, 32], sizes = [2, 32], strides = [1, 1]} : vector<2x128xf32> to vector<2x32xf32>
    %165 = vector.extract_strided_slice %162 {offsets = [0, 64], sizes = [2, 32], strides = [1, 1]} : vector<2x128xf32> to vector<2x32xf32>
    %166 = vector.extract_strided_slice %161 {offsets = [0, 96], sizes = [2, 32], strides = [1, 1]} : vector<2x128xf32> to vector<2x32xf32>
    %167 = arith.mulf %164, %152 : vector<2x32xf32>
    %168 = arith.mulf %163, %165 : vector<2x32xf32>
    %169 = arith.addf %167, %168 : vector<2x32xf32>
    %170 = math.tanh %169 : vector<2x32xf32>
    %171 = arith.mulf %166, %170 : vector<2x32xf32>
    %172 = arith.mulf %171, %4 : vector<2x32xf32>
    %cst_42 = arith.constant dense<0.000000e+00> : vector<2xf32>
    %173 = vector.multi_reduction <add>, %172, %cst_42 [1] : vector<2x32xf32> to vector<2xf32>
    %174 = vector.shape_cast %173 : vector<2xf32> to vector<2x1xf32>
    %c0_i32 = arith.constant 0 : i32
    %175 = vector.broadcast %c0_i32 : i32 to vector<2x8xi32>
    %176 = arith.cmpi eq, %153, %175 : vector<2x8xi32>
    %177 = vector.shape_cast %174 : vector<2x1xf32> to vector<2x1xf32>
    %178 = vector.broadcast %177 : vector<2x1xf32> to vector<2x8xf32>
    %179 = arith.select %176, %178, %154 : vector<2x8xi1>, vector<2x8xf32>
    %c1_43 = arith.constant 1 : index
    %c0_44 = arith.constant 0 : index
    %c0_45 = arith.constant 0 : index
    %180 = vector.load %arg1[%c1_43, %c0_44, %c0_45] : memref<8x2x128xf32, #tpu.memory_space<vmem>>, vector<1x2x128xf32>
    %181 = vector.shape_cast %180 : vector<1x2x128xf32> to vector<2x128xf32>
    %cst_46 = arith.constant dense<0.000000e+00> : vector<2x128xf32>
    %182 = tpu.matmul %171, %1, %cst_46 {dimension_numbers = #tpu.dot_dimension_numbers<[1], [0], [0], [1], [0, 0, 1, 1], [], []>} : vector<2x32xf32>, vector<32x128xf32>, vector<2x128xf32> -> vector<2x128xf32>
    %183 = arith.addf %181, %182 : vector<2x128xf32>
    %184 = arith.negf %183 : vector<2x128xf32>
    %185 = math.exp %184 : vector<2x128xf32>
    %cst_47 = arith.constant 1.000000e+00 : f32
    %186 = vector.broadcast %cst_47 : f32 to vector<2x128xf32>
    %187 = arith.addf %186, %185 : vector<2x128xf32>
    %188 = arith.divf %186, %187 : vector<2x128xf32>
    %189 = math.tanh %183 : vector<2x128xf32>
    %190 = vector.extract_strided_slice %188 {offsets = [0, 0], sizes = [2, 32], strides = [1, 1]} : vector<2x128xf32> to vector<2x32xf32>
    %191 = vector.extract_strided_slice %188 {offsets = [0, 32], sizes = [2, 32], strides = [1, 1]} : vector<2x128xf32> to vector<2x32xf32>
    %192 = vector.extract_strided_slice %189 {offsets = [0, 64], sizes = [2, 32], strides = [1, 1]} : vector<2x128xf32> to vector<2x32xf32>
    %193 = vector.extract_strided_slice %188 {offsets = [0, 96], sizes = [2, 32], strides = [1, 1]} : vector<2x128xf32> to vector<2x32xf32>
    %194 = arith.mulf %191, %169 : vector<2x32xf32>
    %195 = arith.mulf %190, %192 : vector<2x32xf32>
    %196 = arith.addf %194, %195 : vector<2x32xf32>
    %197 = math.tanh %196 : vector<2x32xf32>
    %198 = arith.mulf %193, %197 : vector<2x32xf32>
    %199 = arith.mulf %198, %4 : vector<2x32xf32>
    %cst_48 = arith.constant dense<0.000000e+00> : vector<2xf32>
    %200 = vector.multi_reduction <add>, %199, %cst_48 [1] : vector<2x32xf32> to vector<2xf32>
    %201 = vector.shape_cast %200 : vector<2xf32> to vector<2x1xf32>
    %c1_i32 = arith.constant 1 : i32
    %202 = vector.broadcast %c1_i32 : i32 to vector<2x8xi32>
    %203 = arith.cmpi eq, %153, %202 : vector<2x8xi32>
    %204 = vector.shape_cast %201 : vector<2x1xf32> to vector<2x1xf32>
    %205 = vector.broadcast %204 : vector<2x1xf32> to vector<2x8xf32>
    %206 = arith.select %203, %205, %179 : vector<2x8xi1>, vector<2x8xf32>
    %c2_49 = arith.constant 2 : index
    %c0_50 = arith.constant 0 : index
    %c0_51 = arith.constant 0 : index
    %207 = vector.load %arg1[%c2_49, %c0_50, %c0_51] : memref<8x2x128xf32, #tpu.memory_space<vmem>>, vector<1x2x128xf32>
    %208 = vector.shape_cast %207 : vector<1x2x128xf32> to vector<2x128xf32>
    %cst_52 = arith.constant dense<0.000000e+00> : vector<2x128xf32>
    %209 = tpu.matmul %198, %1, %cst_52 {dimension_numbers = #tpu.dot_dimension_numbers<[1], [0], [0], [1], [0, 0, 1, 1], [], []>} : vector<2x32xf32>, vector<32x128xf32>, vector<2x128xf32> -> vector<2x128xf32>
    %210 = arith.addf %208, %209 : vector<2x128xf32>
    %211 = arith.negf %210 : vector<2x128xf32>
    %212 = math.exp %211 : vector<2x128xf32>
    %cst_53 = arith.constant 1.000000e+00 : f32
    %213 = vector.broadcast %cst_53 : f32 to vector<2x128xf32>
    %214 = arith.addf %213, %212 : vector<2x128xf32>
    %215 = arith.divf %213, %214 : vector<2x128xf32>
    %216 = math.tanh %210 : vector<2x128xf32>
    %217 = vector.extract_strided_slice %215 {offsets = [0, 0], sizes = [2, 32], strides = [1, 1]} : vector<2x128xf32> to vector<2x32xf32>
    %218 = vector.extract_strided_slice %215 {offsets = [0, 32], sizes = [2, 32], strides = [1, 1]} : vector<2x128xf32> to vector<2x32xf32>
    %219 = vector.extract_strided_slice %216 {offsets = [0, 64], sizes = [2, 32], strides = [1, 1]} : vector<2x128xf32> to vector<2x32xf32>
    %220 = vector.extract_strided_slice %215 {offsets = [0, 96], sizes = [2, 32], strides = [1, 1]} : vector<2x128xf32> to vector<2x32xf32>
    %221 = arith.mulf %218, %196 : vector<2x32xf32>
    %222 = arith.mulf %217, %219 : vector<2x32xf32>
    %223 = arith.addf %221, %222 : vector<2x32xf32>
    %224 = math.tanh %223 : vector<2x32xf32>
    %225 = arith.mulf %220, %224 : vector<2x32xf32>
    %226 = arith.mulf %225, %4 : vector<2x32xf32>
    %cst_54 = arith.constant dense<0.000000e+00> : vector<2xf32>
    %227 = vector.multi_reduction <add>, %226, %cst_54 [1] : vector<2x32xf32> to vector<2xf32>
    %228 = vector.shape_cast %227 : vector<2xf32> to vector<2x1xf32>
    %c2_i32 = arith.constant 2 : i32
    %229 = vector.broadcast %c2_i32 : i32 to vector<2x8xi32>
    %230 = arith.cmpi eq, %153, %229 : vector<2x8xi32>
    %231 = vector.shape_cast %228 : vector<2x1xf32> to vector<2x1xf32>
    %232 = vector.broadcast %231 : vector<2x1xf32> to vector<2x8xf32>
    %233 = arith.select %230, %232, %206 : vector<2x8xi1>, vector<2x8xf32>
    %c3_55 = arith.constant 3 : index
    %c0_56 = arith.constant 0 : index
    %c0_57 = arith.constant 0 : index
    %234 = vector.load %arg1[%c3_55, %c0_56, %c0_57] : memref<8x2x128xf32, #tpu.memory_space<vmem>>, vector<1x2x128xf32>
    %235 = vector.shape_cast %234 : vector<1x2x128xf32> to vector<2x128xf32>
    %cst_58 = arith.constant dense<0.000000e+00> : vector<2x128xf32>
    %236 = tpu.matmul %225, %1, %cst_58 {dimension_numbers = #tpu.dot_dimension_numbers<[1], [0], [0], [1], [0, 0, 1, 1], [], []>} : vector<2x32xf32>, vector<32x128xf32>, vector<2x128xf32> -> vector<2x128xf32>
    %237 = arith.addf %235, %236 : vector<2x128xf32>
    %238 = arith.negf %237 : vector<2x128xf32>
    %239 = math.exp %238 : vector<2x128xf32>
    %cst_59 = arith.constant 1.000000e+00 : f32
    %240 = vector.broadcast %cst_59 : f32 to vector<2x128xf32>
    %241 = arith.addf %240, %239 : vector<2x128xf32>
    %242 = arith.divf %240, %241 : vector<2x128xf32>
    %243 = math.tanh %237 : vector<2x128xf32>
    %244 = vector.extract_strided_slice %242 {offsets = [0, 0], sizes = [2, 32], strides = [1, 1]} : vector<2x128xf32> to vector<2x32xf32>
    %245 = vector.extract_strided_slice %242 {offsets = [0, 32], sizes = [2, 32], strides = [1, 1]} : vector<2x128xf32> to vector<2x32xf32>
    %246 = vector.extract_strided_slice %243 {offsets = [0, 64], sizes = [2, 32], strides = [1, 1]} : vector<2x128xf32> to vector<2x32xf32>
    %247 = vector.extract_strided_slice %242 {offsets = [0, 96], sizes = [2, 32], strides = [1, 1]} : vector<2x128xf32> to vector<2x32xf32>
    %248 = arith.mulf %245, %223 : vector<2x32xf32>
    %249 = arith.mulf %244, %246 : vector<2x32xf32>
    %250 = arith.addf %248, %249 : vector<2x32xf32>
    %251 = math.tanh %250 : vector<2x32xf32>
    %252 = arith.mulf %247, %251 : vector<2x32xf32>
    %253 = arith.mulf %252, %4 : vector<2x32xf32>
    %cst_60 = arith.constant dense<0.000000e+00> : vector<2xf32>
    %254 = vector.multi_reduction <add>, %253, %cst_60 [1] : vector<2x32xf32> to vector<2xf32>
    %255 = vector.shape_cast %254 : vector<2xf32> to vector<2x1xf32>
    %c3_i32 = arith.constant 3 : i32
    %256 = vector.broadcast %c3_i32 : i32 to vector<2x8xi32>
    %257 = arith.cmpi eq, %153, %256 : vector<2x8xi32>
    %258 = vector.shape_cast %255 : vector<2x1xf32> to vector<2x1xf32>
    %259 = vector.broadcast %258 : vector<2x1xf32> to vector<2x8xf32>
    %260 = arith.select %257, %259, %233 : vector<2x8xi1>, vector<2x8xf32>
    %c4_61 = arith.constant 4 : index
    %c0_62 = arith.constant 0 : index
    %c0_63 = arith.constant 0 : index
    %261 = vector.load %arg1[%c4_61, %c0_62, %c0_63] : memref<8x2x128xf32, #tpu.memory_space<vmem>>, vector<1x2x128xf32>
    %262 = vector.shape_cast %261 : vector<1x2x128xf32> to vector<2x128xf32>
    %cst_64 = arith.constant dense<0.000000e+00> : vector<2x128xf32>
    %263 = tpu.matmul %252, %1, %cst_64 {dimension_numbers = #tpu.dot_dimension_numbers<[1], [0], [0], [1], [0, 0, 1, 1], [], []>} : vector<2x32xf32>, vector<32x128xf32>, vector<2x128xf32> -> vector<2x128xf32>
    %264 = arith.addf %262, %263 : vector<2x128xf32>
    %265 = arith.negf %264 : vector<2x128xf32>
    %266 = math.exp %265 : vector<2x128xf32>
    %cst_65 = arith.constant 1.000000e+00 : f32
    %267 = vector.broadcast %cst_65 : f32 to vector<2x128xf32>
    %268 = arith.addf %267, %266 : vector<2x128xf32>
    %269 = arith.divf %267, %268 : vector<2x128xf32>
    %270 = math.tanh %264 : vector<2x128xf32>
    %271 = vector.extract_strided_slice %269 {offsets = [0, 0], sizes = [2, 32], strides = [1, 1]} : vector<2x128xf32> to vector<2x32xf32>
    %272 = vector.extract_strided_slice %269 {offsets = [0, 32], sizes = [2, 32], strides = [1, 1]} : vector<2x128xf32> to vector<2x32xf32>
    %273 = vector.extract_strided_slice %270 {offsets = [0, 64], sizes = [2, 32], strides = [1, 1]} : vector<2x128xf32> to vector<2x32xf32>
    %274 = vector.extract_strided_slice %269 {offsets = [0, 96], sizes = [2, 32], strides = [1, 1]} : vector<2x128xf32> to vector<2x32xf32>
    %275 = arith.mulf %272, %250 : vector<2x32xf32>
    %276 = arith.mulf %271, %273 : vector<2x32xf32>
    %277 = arith.addf %275, %276 : vector<2x32xf32>
    %278 = math.tanh %277 : vector<2x32xf32>
    %279 = arith.mulf %274, %278 : vector<2x32xf32>
    %280 = arith.mulf %279, %4 : vector<2x32xf32>
    %cst_66 = arith.constant dense<0.000000e+00> : vector<2xf32>
    %281 = vector.multi_reduction <add>, %280, %cst_66 [1] : vector<2x32xf32> to vector<2xf32>
    %282 = vector.shape_cast %281 : vector<2xf32> to vector<2x1xf32>
    %c4_i32 = arith.constant 4 : i32
    %283 = vector.broadcast %c4_i32 : i32 to vector<2x8xi32>
    %284 = arith.cmpi eq, %153, %283 : vector<2x8xi32>
    %285 = vector.shape_cast %282 : vector<2x1xf32> to vector<2x1xf32>
    %286 = vector.broadcast %285 : vector<2x1xf32> to vector<2x8xf32>
    %287 = arith.select %284, %286, %260 : vector<2x8xi1>, vector<2x8xf32>
    %c5_67 = arith.constant 5 : index
    %c0_68 = arith.constant 0 : index
    %c0_69 = arith.constant 0 : index
    %288 = vector.load %arg1[%c5_67, %c0_68, %c0_69] : memref<8x2x128xf32, #tpu.memory_space<vmem>>, vector<1x2x128xf32>
    %289 = vector.shape_cast %288 : vector<1x2x128xf32> to vector<2x128xf32>
    %cst_70 = arith.constant dense<0.000000e+00> : vector<2x128xf32>
    %290 = tpu.matmul %279, %1, %cst_70 {dimension_numbers = #tpu.dot_dimension_numbers<[1], [0], [0], [1], [0, 0, 1, 1], [], []>} : vector<2x32xf32>, vector<32x128xf32>, vector<2x128xf32> -> vector<2x128xf32>
    %291 = arith.addf %289, %290 : vector<2x128xf32>
    %292 = arith.negf %291 : vector<2x128xf32>
    %293 = math.exp %292 : vector<2x128xf32>
    %cst_71 = arith.constant 1.000000e+00 : f32
    %294 = vector.broadcast %cst_71 : f32 to vector<2x128xf32>
    %295 = arith.addf %294, %293 : vector<2x128xf32>
    %296 = arith.divf %294, %295 : vector<2x128xf32>
    %297 = math.tanh %291 : vector<2x128xf32>
    %298 = vector.extract_strided_slice %296 {offsets = [0, 0], sizes = [2, 32], strides = [1, 1]} : vector<2x128xf32> to vector<2x32xf32>
    %299 = vector.extract_strided_slice %296 {offsets = [0, 32], sizes = [2, 32], strides = [1, 1]} : vector<2x128xf32> to vector<2x32xf32>
    %300 = vector.extract_strided_slice %297 {offsets = [0, 64], sizes = [2, 32], strides = [1, 1]} : vector<2x128xf32> to vector<2x32xf32>
    %301 = vector.extract_strided_slice %296 {offsets = [0, 96], sizes = [2, 32], strides = [1, 1]} : vector<2x128xf32> to vector<2x32xf32>
    %302 = arith.mulf %299, %277 : vector<2x32xf32>
    %303 = arith.mulf %298, %300 : vector<2x32xf32>
    %304 = arith.addf %302, %303 : vector<2x32xf32>
    %305 = math.tanh %304 : vector<2x32xf32>
    %306 = arith.mulf %301, %305 : vector<2x32xf32>
    %307 = arith.mulf %306, %4 : vector<2x32xf32>
    %cst_72 = arith.constant dense<0.000000e+00> : vector<2xf32>
    %308 = vector.multi_reduction <add>, %307, %cst_72 [1] : vector<2x32xf32> to vector<2xf32>
    %309 = vector.shape_cast %308 : vector<2xf32> to vector<2x1xf32>
    %c5_i32 = arith.constant 5 : i32
    %310 = vector.broadcast %c5_i32 : i32 to vector<2x8xi32>
    %311 = arith.cmpi eq, %153, %310 : vector<2x8xi32>
    %312 = vector.shape_cast %309 : vector<2x1xf32> to vector<2x1xf32>
    %313 = vector.broadcast %312 : vector<2x1xf32> to vector<2x8xf32>
    %314 = arith.select %311, %313, %287 : vector<2x8xi1>, vector<2x8xf32>
    %c6_73 = arith.constant 6 : index
    %c0_74 = arith.constant 0 : index
    %c0_75 = arith.constant 0 : index
    %315 = vector.load %arg1[%c6_73, %c0_74, %c0_75] : memref<8x2x128xf32, #tpu.memory_space<vmem>>, vector<1x2x128xf32>
    %316 = vector.shape_cast %315 : vector<1x2x128xf32> to vector<2x128xf32>
    %cst_76 = arith.constant dense<0.000000e+00> : vector<2x128xf32>
    %317 = tpu.matmul %306, %1, %cst_76 {dimension_numbers = #tpu.dot_dimension_numbers<[1], [0], [0], [1], [0, 0, 1, 1], [], []>} : vector<2x32xf32>, vector<32x128xf32>, vector<2x128xf32> -> vector<2x128xf32>
    %318 = arith.addf %316, %317 : vector<2x128xf32>
    %319 = arith.negf %318 : vector<2x128xf32>
    %320 = math.exp %319 : vector<2x128xf32>
    %cst_77 = arith.constant 1.000000e+00 : f32
    %321 = vector.broadcast %cst_77 : f32 to vector<2x128xf32>
    %322 = arith.addf %321, %320 : vector<2x128xf32>
    %323 = arith.divf %321, %322 : vector<2x128xf32>
    %324 = math.tanh %318 : vector<2x128xf32>
    %325 = vector.extract_strided_slice %323 {offsets = [0, 0], sizes = [2, 32], strides = [1, 1]} : vector<2x128xf32> to vector<2x32xf32>
    %326 = vector.extract_strided_slice %323 {offsets = [0, 32], sizes = [2, 32], strides = [1, 1]} : vector<2x128xf32> to vector<2x32xf32>
    %327 = vector.extract_strided_slice %324 {offsets = [0, 64], sizes = [2, 32], strides = [1, 1]} : vector<2x128xf32> to vector<2x32xf32>
    %328 = vector.extract_strided_slice %323 {offsets = [0, 96], sizes = [2, 32], strides = [1, 1]} : vector<2x128xf32> to vector<2x32xf32>
    %329 = arith.mulf %326, %304 : vector<2x32xf32>
    %330 = arith.mulf %325, %327 : vector<2x32xf32>
    %331 = arith.addf %329, %330 : vector<2x32xf32>
    %332 = math.tanh %331 : vector<2x32xf32>
    %333 = arith.mulf %328, %332 : vector<2x32xf32>
    %334 = arith.mulf %333, %4 : vector<2x32xf32>
    %cst_78 = arith.constant dense<0.000000e+00> : vector<2xf32>
    %335 = vector.multi_reduction <add>, %334, %cst_78 [1] : vector<2x32xf32> to vector<2xf32>
    %336 = vector.shape_cast %335 : vector<2xf32> to vector<2x1xf32>
    %c6_i32 = arith.constant 6 : i32
    %337 = vector.broadcast %c6_i32 : i32 to vector<2x8xi32>
    %338 = arith.cmpi eq, %153, %337 : vector<2x8xi32>
    %339 = vector.shape_cast %336 : vector<2x1xf32> to vector<2x1xf32>
    %340 = vector.broadcast %339 : vector<2x1xf32> to vector<2x8xf32>
    %341 = arith.select %338, %340, %314 : vector<2x8xi1>, vector<2x8xf32>
    %c7_79 = arith.constant 7 : index
    %c0_80 = arith.constant 0 : index
    %c0_81 = arith.constant 0 : index
    %342 = vector.load %arg1[%c7_79, %c0_80, %c0_81] : memref<8x2x128xf32, #tpu.memory_space<vmem>>, vector<1x2x128xf32>
    %343 = vector.shape_cast %342 : vector<1x2x128xf32> to vector<2x128xf32>
    %cst_82 = arith.constant dense<0.000000e+00> : vector<2x128xf32>
    %344 = tpu.matmul %333, %1, %cst_82 {dimension_numbers = #tpu.dot_dimension_numbers<[1], [0], [0], [1], [0, 0, 1, 1], [], []>} : vector<2x32xf32>, vector<32x128xf32>, vector<2x128xf32> -> vector<2x128xf32>
    %345 = arith.addf %343, %344 : vector<2x128xf32>
    %346 = arith.negf %345 : vector<2x128xf32>
    %347 = math.exp %346 : vector<2x128xf32>
    %cst_83 = arith.constant 1.000000e+00 : f32
    %348 = vector.broadcast %cst_83 : f32 to vector<2x128xf32>
    %349 = arith.addf %348, %347 : vector<2x128xf32>
    %350 = arith.divf %348, %349 : vector<2x128xf32>
    %351 = math.tanh %345 : vector<2x128xf32>
    %352 = vector.extract_strided_slice %350 {offsets = [0, 0], sizes = [2, 32], strides = [1, 1]} : vector<2x128xf32> to vector<2x32xf32>
    %353 = vector.extract_strided_slice %350 {offsets = [0, 32], sizes = [2, 32], strides = [1, 1]} : vector<2x128xf32> to vector<2x32xf32>
    %354 = vector.extract_strided_slice %351 {offsets = [0, 64], sizes = [2, 32], strides = [1, 1]} : vector<2x128xf32> to vector<2x32xf32>
    %355 = vector.extract_strided_slice %350 {offsets = [0, 96], sizes = [2, 32], strides = [1, 1]} : vector<2x128xf32> to vector<2x32xf32>
    %356 = arith.mulf %353, %331 : vector<2x32xf32>
    %357 = arith.mulf %352, %354 : vector<2x32xf32>
    %358 = arith.addf %356, %357 : vector<2x32xf32>
    %359 = math.tanh %358 : vector<2x32xf32>
    %360 = arith.mulf %355, %359 : vector<2x32xf32>
    %361 = arith.mulf %360, %4 : vector<2x32xf32>
    %cst_84 = arith.constant dense<0.000000e+00> : vector<2xf32>
    %362 = vector.multi_reduction <add>, %361, %cst_84 [1] : vector<2x32xf32> to vector<2xf32>
    %363 = vector.shape_cast %362 : vector<2xf32> to vector<2x1xf32>
    %c7_i32 = arith.constant 7 : i32
    %364 = vector.broadcast %c7_i32 : i32 to vector<2x8xi32>
    %365 = arith.cmpi eq, %153, %364 : vector<2x8xi32>
    %366 = vector.shape_cast %363 : vector<2x1xf32> to vector<2x1xf32>
    %367 = vector.broadcast %366 : vector<2x1xf32> to vector<2x8xf32>
    %368 = arith.select %365, %367, %341 : vector<2x8xi1>, vector<2x8xf32>
    %c0_85 = arith.constant 0 : index
    %c0_86 = arith.constant 0 : index
    %369 = vector.load %arg5[%c0_85, %c0_86] : memref<1x1xf32, #tpu.memory_space<vmem>>, vector<1x1xf32>
    %370 = vector.broadcast %369 : vector<1x1xf32> to vector<2x8xf32>
    %371 = arith.addf %368, %370 : vector<2x8xf32>
    %c0_87 = arith.constant 0 : index
    %c0_88 = arith.constant 0 : index
    %372 = vector.load %arg6[%c0_87, %c0_88] : memref<2x8xf32, #tpu.memory_space<vmem>>, vector<2x8xf32>
    tpu.vector_store %arg6[%c0_87, %c0_88], %371 {strides = array<i32>} : memref<2x8xf32, #tpu.memory_space<vmem>>, vector<2x8xf32>,
    return
  }
}

</mosaic_0001>

<bundles_post_ra>
// kernel: encdec_occ_lstm_forward.1
= control target key start
LH: loop header
LB: loop body
LE: loop exit
PB: predicated region body
PF: predicated region fallthrough
CT: control target
= control target key end

     0   :  { %s1593_s0 = inlined_call_operand.vmem [shape: f32[8,2,128], index: 0, kind: input, shape index: {}]   ;;  %s1594_s1 = inlined_call_operand.vmem [shape: f32[8,2,128], index: 1, kind: input, shape index: {}]   ;;  %s1595_s2 = inlined_call_operand.vmem [shape: f32[32,128], index: 2, kind: input, shape index: {}]   ;;  %s1596_s3 = inlined_call_operand.vmem [shape: f32[32,128], index: 3, kind: input, shape index: {}]   ;;  %s1597_s4 = inlined_call_operand.vmem [shape: f32[1,32], index: 4, kind: input, shape index: {}]   ;;  %s1598_s5 = inlined_call_operand.<no memory space> [shape: f32[1,1], index: 5, kind: input, shape index: {}]   ;;  %s1599_s6 = inlined_call_operand.hbm [shape: f32[2,8], index: 6, kind: output, shape index: {}]  }
   0x1   :  { %v11_v0 = vstv %s1598_s5 }
   0x2   :  { %12 = vst [vmem:[#allocation2] sm:$0x1] %v11_v0 }
   0x3   :  { %v37_v1 = vld [vmem:[%s1593_s0] sm:$0x3] }
   0x4   :  { %1183 = vtanh.f32 %v37_v1 }
   0x5   :  { %13 = vsyncpa [#allocation4], 0  ;;  %s1335_s25 = smov 64   ;;  %v1130_v3 = vmul.f32 -1.442695, %v37_v1  ;;  %s1336_s5 = smov 32  }
   0x6   :  { %v29_v22 = vld [vmem:[%s1595_s2 + $0x18] sm:$0xff]  ;;  %v28_v23 = vld [vmem:[%s1595_s2 + $0x10] sm:$0xff]  ;;  %v27_v24 = vld [vmem:[%s1595_s2 + $0x8] sm:$0xff]  ;;  %vm80_vm4 = vcmask 261120   ;;  %s1337_s21 = smov 96   ;;  %s1121_s24 = sshll.u32 %s1599_s6, 4  ;;  %s1122_s24 = int_to_ptr.hbm [resolvable:$true] %s1121_s24 }
   0x7   :  { %1185 = vpow2.f32 %v1130_v3  ;;  %95 = vmatpush.msra.mxu0 %v29_v22  ;;  %160 = vmatpush.msra.mxu1 %v29_v22  ;;  %v26_v27 = vld [vmem:[%s1595_s2] sm:$0xff] }
   0x8   :  { %225 = vmatpush.msra.mxu2 %v29_v22  ;;  %290 = vmatpush.msra.mxu3 %v29_v22  ;;  %v1131_v29 = vld [vmem:[%s1593_s0 + $0x2] sm:$0x3]  ;;  %v1134_v55 = vld [vmem:[%s1593_s0 + $0x4] sm:$0x3] }
   0x9   :  { %96 = vmatpush.msra.mxu0 %v28_v23  ;;  %161 = vmatpush.msra.mxu1 %v28_v23 }
   0xa   :  { %v1184_v2 = vpop.eup %1183  ;;  %226 = vmatpush.msra.mxu2 %v28_v23  ;;  %291 = vmatpush.msra.mxu3 %v28_v23 }
   0xb   :  { %60 = vrot.lane.b32.xlu0 %v1184_v2, %s1335_s25  ;;  %97 = vmatpush.msra.mxu0 %v27_v24 }
   0xc   :  { %162 = vmatpush.msra.mxu1 %v27_v24  ;;  %227 = vmatpush.msra.mxu2 %v27_v24 }
   0xd   :  { %v1186_v4 = vpop.eup %1185  ;;  %292 = vmatpush.msra.mxu3 %v27_v24  ;;  %98 = vmatpush.msra.mxu0 %v26_v27 }
   0xe   :  { %v41_v5 = vadd.f32 1.0, %v1186_v4  ;;  %163 = vmatpush.msra.mxu1 %v26_v27  ;;  %228 = vmatpush.msra.mxu2 %v26_v27 }
   0xf   :  { %293 = vmatpush.msra.mxu3 %v26_v27  ;;  %355 = vmatpush.msrb.mxu0 %v29_v22 }
  0x10   :  { %1187 = vrcp.f32 %v41_v5  ;;  %vm47_vm0 = vweird.f32 %v41_v5  ;;  %v53_v10 = vand.u32 2147483648, %v41_v5  ;;  %v51_v12 = vand.u32 2147483647, %v41_v5  ;;  %420 = vmatpush.msrb.mxu1 %v29_v22  ;;  %485 = vmatpush.msrb.mxu2 %v29_v22 }
  0x11   :  { %356 = vmatpush.msrb.mxu0 %v28_v23 }
  0x12   :  { %v54_v13 = vor.u32 1.1754944e-38, %v53_v10  ;;  %vm52_vm3 = vcmp.eq.f32.partialorder %v51_v12, 8.507059e+37  ;;  %421 = vmatpush.msrb.mxu1 %v28_v23  ;;  %486 = vmatpush.msrb.mxu2 %v28_v23 }
  0x13   :  { %357 = vmatpush.msrb.mxu0 %v27_v24 }
  0x14   :  { %422 = vmatpush.msrb.mxu1 %v27_v24  ;;  %487 = vmatpush.msrb.mxu2 %v27_v24 }
  0x15   :  { %358 = vmatpush.msrb.mxu0 %v26_v27 }
  0x16   :  { %v1188_v6 = vpop.eup %1187  ;;  %423 = vmatpush.msrb.mxu1 %v26_v27  ;;  %488 = vmatpush.msrb.mxu2 %v26_v27 }
  0x17   :  { %v43_v7 = vmul.f32 %v1188_v6, %v41_v5  ;;  %vm48_vm1 = vweird.f32 %v1188_v6 }
  0x18   :  { %vm49_vm2 = vmor %vm47_vm0, %vm48_vm1 }
  0x19   :  { %v44_v8 = vsub.f32 1.0, %v43_v7 }
  0x1b   :  { %v45_v9 = vmul.f32 %v1188_v6, %v44_v8 }
  0x1d   :  { %v46_v11 = vadd.f32 %v1188_v6, %v45_v9 }
  0x1f   :  { %v50_v14 = vsel %vm49_vm2, %v1188_v6, %v46_v11 }
  0x20   :  { %v55_v15 = vsel %vm52_vm3, %v54_v13, %v50_v14 }
  0x21   :  { %v58_v18 = vmul.f32 0.0, %v55_v15 }
  0x7d   :  { %v61_v16 = vpop.permute.xlu0 %60 }
  0x7e   :  { %v63_v17 = vmul.f32 %v61_v16, %v55_v15 }
  0x80   :  { %65 = vrot.lane.b32.xlu0 %v63_v17, %s1336_s5  ;;  %v1137_v17 = vld [vmem:[%s1593_s0 + $0x6] sm:$0x3] }
  0xf2   :  { %v66_v19 = vpop.permute.xlu0 %65 }
  0xf3   :  { %v1383_v20 = vadd.f32 %v66_v19, %v58_v18 }
  0xf5   :  { %1189 = vtanh.f32 %v1383_v20 }
  0xfb   :  { %v1190_v21 = vpop.eup %1189 }
  0xfc   :  { %71 = vrot.lane.b32.xlu1 %v1190_v21, %s1335_s25 }
 0x16e   :  { %v72_v25 = vpop.permute.xlu1 %71 }
 0x16f   :  { %v74_v26 = vmul.f32 %v72_v25, %v55_v15 }
 0x171   :  { %78 = vrot.lane.b32.xlu1 %v74_v26, %s1336_s5 }
 0x1e3   :  { %v79_v28 = vpop.permute.xlu1 %78 }
 0x1e4   :  { %1132 = vmatmul.msk.f32.vlgmr.msra.gmra.mxu0 %vm80_vm4, %v79_v28 }
 0x261   :  { %v100_v30 = vpop.f32.mrf.mxu0 }
 0x262   :  { %v103_v31 = vadd.f32 %v1131_v29, %v100_v30 }
 0x264   :  { %1191 = vtanh.f32 %v103_v31  ;;  %v1133_v33 = vmul.f32 -1.442695, %v103_v31 }
 0x266   :  { %1193 = vpow2.f32 %v1133_v33 }
 0x26a   :  { %v1192_v32 = vpop.eup %1191 }
 0x26b   :  { %126 = vrot.lane.b32.xlu2 %v1192_v32, %s1335_s25 }
 0x26c   :  { %v1194_v34 = vpop.eup %1193 }
 0x26d   :  { %v107_v35 = vadd.f32 1.0, %v1194_v34 }
 0x26f   :  { %1195 = vrcp.f32 %v107_v35  ;;  %v119_v41 = vand.u32 2147483648, %v107_v35  ;;  %vm113_vm6 = vweird.f32 %v107_v35  ;;  %v117_v42 = vand.u32 2147483647, %v107_v35 }
 0x271   :  { %v120_v44 = vor.u32 1.1754944e-38, %v119_v41  ;;  %vm118_vm8 = vcmp.eq.f32.partialorder %v117_v42, 8.507059e+37 }
 0x275   :  { %v1196_v36 = vpop.eup %1195 }
 0x276   :  { %v109_v37 = vmul.f32 %v1196_v36, %v107_v35  ;;  %vm114_vm5 = vweird.f32 %v1196_v36 }
 0x277   :  { %vm115_vm7 = vmor %vm113_vm6, %vm114_vm5 }
 0x278   :  { %v110_v38 = vsub.f32 1.0, %v109_v37 }
 0x27a   :  { %v111_v39 = vmul.f32 %v1196_v36, %v110_v38 }
 0x27c   :  { %v112_v40 = vadd.f32 %v1196_v36, %v111_v39 }
 0x27e   :  { %v116_v43 = vsel %vm115_vm7, %v1196_v36, %v112_v40 }
 0x27f   :  { %v121_v46 = vsel %vm118_vm8, %v120_v44, %v116_v43  ;;  %v1140_v43 = vld [vmem:[%s1593_s0 + $0x8] sm:$0x3] }
 0x280   :  { %v124_v48 = vmul.f32 %v121_v46, %v1383_v20 }
 0x2c5   :  { %v127_v45 = vpop.permute.xlu2 %126 }
 0x2c6   :  { %v129_v47 = vmul.f32 %v127_v45, %v121_v46 }
 0x2c8   :  { %131 = vrot.lane.b32.xlu2 %v129_v47, %s1336_s5 }
 0x322   :  { %v132_v49 = vpop.permute.xlu2 %131 }
 0x323   :  { %v134_v50 = vadd.f32 %v132_v49, %v124_v48 }
 0x325   :  { %1197 = vtanh.f32 %v134_v50 }
 0x32b   :  { %v1198_v51 = vpop.eup %1197 }
 0x32c   :  { %137 = vrot.lane.b32.xlu0 %v1198_v51, %s1335_s25 }
 0x39e   :  { %v138_v52 = vpop.permute.xlu0 %137 }
 0x39f   :  { %v140_v53 = vmul.f32 %v138_v52, %v121_v46 }
 0x3a1   :  { %144 = vrot.lane.b32.xlu1 %v140_v53, %s1336_s5 }
 0x413   :  { %v145_v54 = vpop.permute.xlu1 %144 }
 0x414   :  { %1135 = vmatmul.msk.f32.vlgmr.msra.gmra.mxu1 %vm80_vm4, %v145_v54 }
 0x491   :  { %v165_v56 = vpop.f32.mrf.mxu1 }
 0x492   :  { %v168_v57 = vadd.f32 %v1134_v55, %v165_v56 }
 0x494   :  { %1199 = vtanh.f32 %v168_v57  ;;  %v1136_v59 = vmul.f32 -1.442695, %v168_v57 }
 0x496   :  { %1201 = vpow2.f32 %v1136_v59 }
 0x49a   :  { %v1200_v58 = vpop.eup %1199 }
 0x49b   :  { %191 = vrot.lane.b32.xlu2 %v1200_v58, %s1335_s25 }
 0x49c   :  { %v1202_v60 = vpop.eup %1201 }
 0x49d   :  { %v172_v61 = vadd.f32 1.0, %v1202_v60 }
 0x49f   :  { %1203 = vrcp.f32 %v172_v61  ;;  %v184_v3 = vand.u32 2147483648, %v172_v61  ;;  %vm178_vm10 = vweird.f32 %v172_v61  ;;  %v182_v4 = vand.u32 2147483647, %v172_v61 }
 0x4a1   :  { %v185_v6 = vor.u32 1.1754944e-38, %v184_v3  ;;  %vm183_vm12 = vcmp.eq.f32.partialorder %v182_v4, 8.507059e+37 }
 0x4a5   :  { %v1204_v62 = vpop.eup %1203 }
 0x4a6   :  { %v174_v63 = vmul.f32 %v1204_v62, %v172_v61  ;;  %vm179_vm9 = vweird.f32 %v1204_v62 }
 0x4a7   :  { %vm180_vm11 = vmor %vm178_vm10, %vm179_vm9 }
 0x4a8   :  { %v175_v0 = vsub.f32 1.0, %v174_v63 }
 0x4aa   :  { %v176_v1 = vmul.f32 %v1204_v62, %v175_v0 }
 0x4ac   :  { %v177_v2 = vadd.f32 %v1204_v62, %v176_v1 }
 0x4ae   :  { %v181_v5 = vsel %vm180_vm11, %v1204_v62, %v177_v2 }
 0x4af   :  { %v186_v8 = vsel %vm183_vm12, %v185_v6, %v181_v5  ;;  %v1143_v5 = vld [vmem:[%s1593_s0 + $0xa] sm:$0x3] }
 0x4b0   :  { %v189_v10 = vmul.f32 %v186_v8, %v134_v50 }
 0x4f5   :  { %v192_v7 = vpop.permute.xlu2 %191 }
 0x4f6   :  { %v194_v9 = vmul.f32 %v192_v7, %v186_v8 }
 0x4f8   :  { %196 = vrot.lane.b32.xlu0 %v194_v9, %s1336_s5 }
 0x56a   :  { %v197_v11 = vpop.permute.xlu0 %196 }
 0x56b   :  { %v199_v12 = vadd.f32 %v197_v11, %v189_v10 }
 0x56d   :  { %1205 = vtanh.f32 %v199_v12 }
 0x573   :  { %v1206_v13 = vpop.eup %1205 }
 0x574   :  { %202 = vrot.lane.b32.xlu1 %v1206_v13, %s1335_s25 }
 0x5e6   :  { %v203_v14 = vpop.permute.xlu1 %202 }
 0x5e7   :  { %v205_v15 = vmul.f32 %v203_v14, %v186_v8 }
 0x5e9   :  { %209 = vrot.lane.b32.xlu2 %v205_v15, %s1336_s5 }
 0x643   :  { %v210_v16 = vpop.permute.xlu2 %209 }
 0x644   :  { %1138 = vmatmul.msk.f32.vlgmr.msra.gmra.mxu2 %vm80_vm4, %v210_v16 }
 0x6c7   :  { %v230_v18 = vpop.f32.mrf.mxu2 }
 0x6c8   :  { %v233_v19 = vadd.f32 %v1137_v17, %v230_v18 }
 0x6ca   :  { %1207 = vtanh.f32 %v233_v19  ;;  %v1139_v21 = vmul.f32 -1.442695, %v233_v19 }
 0x6cc   :  { %1209 = vpow2.f32 %v1139_v21 }
 0x6d0   :  { %v1208_v20 = vpop.eup %1207 }
 0x6d1   :  { %256 = vrot.lane.b32.xlu0 %v1208_v20, %s1335_s25 }
 0x6d2   :  { %v1210_v22 = vpop.eup %1209 }
 0x6d3   :  { %v237_v23 = vadd.f32 1.0, %v1210_v22 }
 0x6d5   :  { %1211 = vrcp.f32 %v237_v23  ;;  %v249_v29 = vand.u32 2147483648, %v237_v23  ;;  %vm243_vm14 = vweird.f32 %v237_v23  ;;  %v247_v30 = vand.u32 2147483647, %v237_v23 }
 0x6d7   :  { %v250_v32 = vor.u32 1.1754944e-38, %v249_v29  ;;  %vm248_vm0 = vcmp.eq.f32.partialorder %v247_v30, 8.507059e+37 }
 0x6db   :  { %v1212_v24 = vpop.eup %1211 }
 0x6dc   :  { %v239_v25 = vmul.f32 %v1212_v24, %v237_v23  ;;  %vm244_vm13 = vweird.f32 %v1212_v24 }
 0x6dd   :  { %vm245_vm15 = vmor %vm243_vm14, %vm244_vm13 }
 0x6de   :  { %v240_v26 = vsub.f32 1.0, %v239_v25 }
 0x6e0   :  { %v241_v27 = vmul.f32 %v1212_v24, %v240_v26 }
 0x6e2   :  { %v242_v28 = vadd.f32 %v1212_v24, %v241_v27 }
 0x6e4   :  { %v246_v31 = vsel %vm245_vm15, %v1212_v24, %v242_v28 }
 0x6e5   :  { %v251_v34 = vsel %vm248_vm0, %v250_v32, %v246_v31  ;;  %v1146_v31 = vld [vmem:[%s1593_s0 + $0xc] sm:$0x3] }
 0x6e6   :  { %v254_v36 = vmul.f32 %v251_v34, %v199_v12 }
 0x743   :  { %v257_v33 = vpop.permute.xlu0 %256 }
 0x744   :  { %v259_v35 = vmul.f32 %v257_v33, %v251_v34 }
 0x746   :  { %261 = vrot.lane.b32.xlu1 %v259_v35, %s1336_s5 }
 0x7b8   :  { %v262_v37 = vpop.permute.xlu1 %261 }
 0x7b9   :  { %v264_v38 = vadd.f32 %v262_v37, %v254_v36 }
 0x7bb   :  { %1213 = vtanh.f32 %v264_v38 }
 0x7c1   :  { %v1214_v39 = vpop.eup %1213 }
 0x7c2   :  { %267 = vrot.lane.b32.xlu2 %v1214_v39, %s1335_s25 }
 0x81c   :  { %v268_v40 = vpop.permute.xlu2 %267 }
 0x81d   :  { %v270_v41 = vmul.f32 %v268_v40, %v251_v34 }
 0x81f   :  { %274 = vrot.lane.b32.xlu0 %v270_v41, %s1336_s5 }
 0x891   :  { %v275_v42 = vpop.permute.xlu0 %274 }
 0x892   :  { %1141 = vmatmul.msk.f32.vlgmr.msra.gmra.mxu3 %vm80_vm4, %v275_v42 }
 0x915   :  { %v295_v44 = vpop.f32.mrf.mxu3 }
 0x916   :  { %v298_v45 = vadd.f32 %v1140_v43, %v295_v44 }
 0x918   :  { %1215 = vtanh.f32 %v298_v45  ;;  %v1142_v47 = vmul.f32 -1.442695, %v298_v45 }
 0x91a   :  { %1217 = vpow2.f32 %v1142_v47 }
 0x91e   :  { %v1216_v46 = vpop.eup %1215 }
 0x91f   :  { %321 = vrot.lane.b32.xlu1 %v1216_v46, %s1335_s25 }
 0x920   :  { %v1218_v48 = vpop.eup %1217 }
 0x921   :  { %v302_v49 = vadd.f32 1.0, %v1218_v48 }
 0x923   :  { %1219 = vrcp.f32 %v302_v49  ;;  %v314_v55 = vand.u32 2147483648, %v302_v49  ;;  %vm308_vm2 = vweird.f32 %v302_v49  ;;  %v312_v56 = vand.u32 2147483647, %v302_v49 }
 0x925   :  { %v315_v58 = vor.u32 1.1754944e-38, %v314_v55  ;;  %vm313_vm5 = vcmp.eq.f32.partialorder %v312_v56, 8.507059e+37 }
 0x929   :  { %v1220_v50 = vpop.eup %1219 }
 0x92a   :  { %v304_v51 = vmul.f32 %v1220_v50, %v302_v49  ;;  %vm309_vm1 = vweird.f32 %v1220_v50 }
 0x92b   :  { %vm310_vm3 = vmor %vm308_vm2, %vm309_vm1 }
 0x92c   :  { %v305_v52 = vsub.f32 1.0, %v304_v51 }
 0x92e   :  { %v306_v53 = vmul.f32 %v1220_v50, %v305_v52 }
 0x930   :  { %v307_v54 = vadd.f32 %v1220_v50, %v306_v53 }
 0x932   :  { %v311_v57 = vsel %vm310_vm3, %v1220_v50, %v307_v54 }
 0x933   :  { %v316_v60 = vsel %vm313_vm5, %v315_v58, %v311_v57  ;;  %v527_v57 = vld [vmem:[%s1594_s1] sm:$0x3] }
 0x934   :  { %v319_v62 = vmul.f32 %v316_v60, %v264_v38 }
 0x991   :  { %v322_v59 = vpop.permute.xlu1 %321 }
 0x992   :  { %v324_v61 = vmul.f32 %v322_v59, %v316_v60  ;;  %v1149_v59 = vld [vmem:[%s1593_s0 + $0xe] sm:$0x3] }
 0x994   :  { %326 = vrot.lane.b32.xlu2 %v324_v61, %s1336_s5 }
 0x9ee   :  { %v327_v63 = vpop.permute.xlu2 %326 }
 0x9ef   :  { %v329_v0 = vadd.f32 %v327_v63, %v319_v62  ;;  %v1152_v63 = vmul.f32 -1.442695, %v527_v57 }
 0x9f1   :  { %1221 = vtanh.f32 %v329_v0 }
 0x9f7   :  { %v1222_v1 = vpop.eup %1221 }
 0x9f8   :  { %332 = vrot.lane.b32.xlu0 %v1222_v1, %s1335_s25 }
 0xa6a   :  { %v333_v2 = vpop.permute.xlu0 %332 }
 0xa6b   :  { %v335_v3 = vmul.f32 %v333_v2, %v316_v60 }
 0xa6d   :  { %339 = vrot.lane.b32.xlu1 %v335_v3, %s1336_s5 }
 0xadf   :  { %v340_v4 = vpop.permute.xlu1 %339 }
 0xae0   :  { %1144 = vmatmul.msk.f32.vlgmr.msrb.gmra.mxu0 %vm80_vm4, %v340_v4 }
 0xb5d   :  { %v360_v6 = vpop.f32.mrf.mxu0 }
 0xb5e   :  { %v363_v7 = vadd.f32 %v1143_v5, %v360_v6 }
 0xb60   :  { %1223 = vtanh.f32 %v363_v7  ;;  %v1145_v9 = vmul.f32 -1.442695, %v363_v7 }
 0xb62   :  { %1225 = vpow2.f32 %v1145_v9 }
 0xb66   :  { %v1224_v8 = vpop.eup %1223 }
 0xb67   :  { %386 = vrot.lane.b32.xlu2 %v1224_v8, %s1335_s25 }
 0xb68   :  { %v1226_v10 = vpop.eup %1225 }
 0xb69   :  { %v367_v11 = vadd.f32 1.0, %v1226_v10 }
 0xb6b   :  { %1227 = vrcp.f32 %v367_v11  ;;  %v379_v17 = vand.u32 2147483648, %v367_v11  ;;  %vm373_vm7 = vweird.f32 %v367_v11  ;;  %v377_v18 = vand.u32 2147483647, %v367_v11 }
 0xb6d   :  { %v380_v20 = vor.u32 1.1754944e-38, %v379_v17  ;;  %vm378_vm9 = vcmp.eq.f32.partialorder %v377_v18, 8.507059e+37 }
 0xb71   :  { %v1228_v12 = vpop.eup %1227 }
 0xb72   :  { %v369_v13 = vmul.f32 %v1228_v12, %v367_v11  ;;  %vm374_vm6 = vweird.f32 %v1228_v12 }
 0xb73   :  { %vm375_vm8 = vmor %vm373_vm7, %vm374_vm6 }
 0xb74   :  { %v370_v14 = vsub.f32 1.0, %v369_v13 }
 0xb76   :  { %v371_v15 = vmul.f32 %v1228_v12, %v370_v14 }
 0xb78   :  { %v372_v16 = vadd.f32 %v1228_v12, %v371_v15 }
 0xb7a   :  { %v376_v19 = vsel %vm375_vm8, %v1228_v12, %v372_v16 }
 0xb7b   :  { %v381_v22 = vsel %vm378_vm9, %v380_v20, %v376_v19 }
 0xb7c   :  { %v384_v24 = vmul.f32 %v381_v22, %v329_v0 }
 0xbc1   :  { %v387_v21 = vpop.permute.xlu2 %386 }
 0xbc2   :  { %v389_v23 = vmul.f32 %v387_v21, %v381_v22 }
 0xbc4   :  { %391 = vrot.lane.b32.xlu0 %v389_v23, %s1336_s5 }
 0xc36   :  { %v392_v25 = vpop.permute.xlu0 %391 }
 0xc37   :  { %v394_v26 = vadd.f32 %v392_v25, %v384_v24 }
 0xc39   :  { %1229 = vtanh.f32 %v394_v26 }
 0xc3f   :  { %v1230_v27 = vpop.eup %1229 }
 0xc40   :  { %397 = vrot.lane.b32.xlu1 %v1230_v27, %s1335_s25 }
 0xcb2   :  { %v398_v28 = vpop.permute.xlu1 %397 }
 0xcb3   :  { %v400_v29 = vmul.f32 %v398_v28, %v381_v22 }
 0xcb5   :  { %404 = vrot.lane.b32.xlu2 %v400_v29, %s1336_s5 }
 0xd0f   :  { %v405_v30 = vpop.permute.xlu2 %404 }
 0xd10   :  { %1147 = vmatmul.msk.f32.vlgmr.msrb.gmra.mxu1 %vm80_vm4, %v405_v30 }
 0xd8d   :  { %v425_v32 = vpop.f32.mrf.mxu1 }
 0xd8e   :  { %v428_v33 = vadd.f32 %v1146_v31, %v425_v32 }
 0xd90   :  { %1231 = vtanh.f32 %v428_v33  ;;  %v1148_v35 = vmul.f32 -1.442695, %v428_v33 }
 0xd92   :  { %1233 = vpow2.f32 %v1148_v35 }
 0xd96   :  { %v1232_v34 = vpop.eup %1231 }
 0xd97   :  { %451 = vrot.lane.b32.xlu0 %v1232_v34, %s1335_s25 }
 0xd98   :  { %v1234_v36 = vpop.eup %1233 }
 0xd99   :  { %v432_v37 = vadd.f32 1.0, %v1234_v36  ;;  %v33_v36 = vld [vmem:[%s1596_s3 + $0x18] sm:$0xff] }
 0xd9a   :  { %598 = vmatpush.msrb.mxu3 %v33_v36  ;;  %673 = vmatpush.msra.mxu0 %v33_v36 }
 0xd9b   :  { %1235 = vrcp.f32 %v432_v37  ;;  %v444_v43 = vand.u32 2147483648, %v432_v37  ;;  %vm438_vm11 = vweird.f32 %v432_v37  ;;  %v442_v44 = vand.u32 2147483647, %v432_v37  ;;  %748 = vmatpush.msra.mxu1 %v33_v36  ;;  %823 = vmatpush.msra.mxu2 %v33_v36 }
 0xd9d   :  { %v445_v46 = vor.u32 1.1754944e-38, %v444_v43  ;;  %vm443_vm13 = vcmp.eq.f32.partialorder %v442_v44, 8.507059e+37  ;;  %v1153_v43 = vld [vmem:[%s1594_s1 + $0x2] sm:$0x3] }
 0xda1   :  { %v1236_v38 = vpop.eup %1235 }
 0xda2   :  { %v434_v39 = vmul.f32 %v1236_v38, %v432_v37  ;;  %vm439_vm10 = vweird.f32 %v1236_v38  ;;  %v32_v37 = vld [vmem:[%s1596_s3 + $0x10] sm:$0xff] }
 0xda3   :  { %vm440_vm12 = vmor %vm438_vm11, %vm439_vm10  ;;  %599 = vmatpush.msrb.mxu3 %v32_v37  ;;  %674 = vmatpush.msra.mxu0 %v32_v37 }
 0xda4   :  { %v435_v40 = vsub.f32 1.0, %v434_v39  ;;  %v30_v39 = vld [vmem:[%s1596_s3] sm:$0xff]  ;;  %749 = vmatpush.msra.mxu1 %v32_v37  ;;  %824 = vmatpush.msra.mxu2 %v32_v37 }
 0xda6   :  { %v436_v41 = vmul.f32 %v1236_v38, %v435_v40 }
 0xda8   :  { %v437_v42 = vadd.f32 %v1236_v38, %v436_v41 }
 0xdaa   :  { %v441_v45 = vsel %vm440_vm12, %v1236_v38, %v437_v42  ;;  %v31_v38 = vld [vmem:[%s1596_s3 + $0x8] sm:$0xff] }
 0xdab   :  { %v446_v48 = vsel %vm443_vm13, %v445_v46, %v441_v45  ;;  %600 = vmatpush.msrb.mxu3 %v31_v38  ;;  %675 = vmatpush.msra.mxu0 %v31_v38 }
 0xdac   :  { %v449_v50 = vmul.f32 %v446_v48, %v394_v26  ;;  %750 = vmatpush.msra.mxu1 %v31_v38  ;;  %825 = vmatpush.msra.mxu2 %v31_v38 }
 0xdad   :  { %601 = vmatpush.msrb.mxu3 %v30_v39  ;;  %676 = vmatpush.msra.mxu0 %v30_v39 }
 0xdae   :  { %751 = vmatpush.msra.mxu1 %v30_v39  ;;  %826 = vmatpush.msra.mxu2 %v30_v39 }
 0xdaf   :  { %898 = vmatpush.msra.mxu3 %v33_v36  ;;  %973 = vmatpush.msrb.mxu0 %v33_v36 }
 0xdb0   :  { %1048 = vmatpush.msrb.mxu1 %v33_v36 }
 0xdb1   :  { %899 = vmatpush.msra.mxu3 %v32_v37  ;;  %974 = vmatpush.msrb.mxu0 %v32_v37 }
 0xdb2   :  { %1049 = vmatpush.msrb.mxu1 %v32_v37 }
 0xdb3   :  { %900 = vmatpush.msra.mxu3 %v31_v38  ;;  %975 = vmatpush.msrb.mxu0 %v31_v38 }
 0xdb4   :  { %1050 = vmatpush.msrb.mxu1 %v31_v38 }
 0xdb5   :  { %901 = vmatpush.msra.mxu3 %v30_v39  ;;  %976 = vmatpush.msrb.mxu0 %v30_v39 }
 0xdb6   :  { %1051 = vmatpush.msrb.mxu1 %v30_v39 }
 0xe09   :  { %v452_v47 = vpop.permute.xlu0 %451 }
 0xe0a   :  { %v454_v49 = vmul.f32 %v452_v47, %v446_v48 }
 0xe0c   :  { %456 = vrot.lane.b32.xlu1 %v454_v49, %s1336_s5 }
 0xe7e   :  { %v457_v51 = vpop.permute.xlu1 %456 }
 0xe7f   :  { %v1447_v52 = vadd.f32 %v457_v51, %v449_v50 }
 0xe81   :  { %1237 = vtanh.f32 %v1447_v52 }
 0xe82   :  { %1239 = vtanh.f32 %v527_v57 }
 0xe87   :  { %v1238_v53 = vpop.eup %1237 }
 0xe88   :  { %462 = vrot.lane.b32.xlu2 %v1238_v53, %s1335_s25  ;;  %v1240_v58 = vpop.eup %1239 }
 0xe90   :  { %550 = vrot.lane.b32.xlu2 %v1240_v58, %s1335_s25 }
 0xee2   :  { %v463_v54 = vpop.permute.xlu2 %462 }
 0xee3   :  { %v465_v55 = vmul.f32 %v463_v54, %v446_v48 }
 0xee5   :  { %469 = vrot.lane.b32.xlu0 %v465_v55, %s1336_s5 }
 0xeea   :  { %v551_v14 = vpop.permute.xlu2 %550 }
 0xf57   :  { %v470_v56 = vpop.permute.xlu0 %469 }
 0xf58   :  { %1150 = vmatmul.msk.f32.vlgmr.msrb.gmra.mxu2 %vm80_vm4, %v470_v56 }
 0xfdb   :  { %v490_v60 = vpop.f32.mrf.mxu2 }
 0xfdc   :  { %v493_v61 = vadd.f32 %v1149_v59, %v490_v60 }
 0xfde   :  { %1241 = vtanh.f32 %v493_v61  ;;  %v1151_v2 = vmul.f32 -1.442695, %v493_v61 }
 0xfdf   :  { %1243 = vpow2.f32 %v1152_v63 }
 0xfe4   :  { %v1242_v62 = vpop.eup %1241 }
 0xfe5   :  { %516 = vrot.lane.b32.xlu1 %v1242_v62, %s1335_s25  ;;  %v1244_v0 = vpop.eup %1243 }
 0xfe6   :  { %v531_v1 = vadd.f32 1.0, %v1244_v0 }
 0xfe8   :  { %1245 = vrcp.f32 %v531_v1  ;;  %v543_v9 = vand.u32 2147483648, %v531_v1  ;;  %vm537_vm14 = vweird.f32 %v531_v1  ;;  %v541_v11 = vand.u32 2147483647, %v531_v1 }
 0xfe9   :  { %1247 = vpow2.f32 %v1151_v2 }
 0xfea   :  { %v544_v12 = vor.u32 1.1754944e-38, %v543_v9  ;;  %vm542_vm1 = vcmp.eq.f32.partialorder %v541_v11, 8.507059e+37 }
 0xfee   :  { %v1246_v3 = vpop.eup %1245 }
 0xfef   :  { %v533_v4 = vmul.f32 %v1246_v3, %v531_v1  ;;  %v1248_v5 = vpop.eup %1247  ;;  %vm538_vm15 = vweird.f32 %v1246_v3 }
 0xff0   :  { %v497_v8 = vadd.f32 1.0, %v1248_v5  ;;  %vm539_vm0 = vmor %vm537_vm14, %vm538_vm15  ;;  %v1156_v5 = vld [vmem:[%s1594_s1 + $0x4] sm:$0x3] }
 0xff1   :  { %v534_v6 = vsub.f32 1.0, %v533_v4 }
 0xff2   :  { %1249 = vrcp.f32 %v497_v8  ;;  %v509_v22 = vand.u32 2147483648, %v497_v8  ;;  %vm503_vm3 = vweird.f32 %v497_v8  ;;  %v507_v23 = vand.u32 2147483647, %v497_v8 }
 0xff3   :  { %v535_v7 = vmul.f32 %v1246_v3, %v534_v6 }
 0xff4   :  { %v510_v25 = vor.u32 1.1754944e-38, %v509_v22  ;;  %vm508_vm6 = vcmp.eq.f32.partialorder %v507_v23, 8.507059e+37 }
 0xff5   :  { %v536_v10 = vadd.f32 %v1246_v3, %v535_v7 }
 0xff7   :  { %v540_v13 = vsel %vm539_vm0, %v1246_v3, %v536_v10 }
 0xff8   :  { %v545_v15 = vsel %vm542_vm1, %v544_v12, %v540_v13  ;;  %v1250_v17 = vpop.eup %1249 }
 0xff9   :  { %v553_v16 = vmul.f32 %v551_v14, %v545_v15  ;;  %v499_v18 = vmul.f32 %v1250_v17, %v497_v8  ;;  %vm504_vm2 = vweird.f32 %v1250_v17 }
 0xffa   :  { %vm505_vm5 = vmor %vm503_vm3, %vm504_vm2 }
 0xffb   :  { %555 = vrot.lane.b32.xlu1 %v553_v16, %s1336_s5  ;;  %v500_v19 = vsub.f32 1.0, %v499_v18 }
 0xffd   :  { %v501_v20 = vmul.f32 %v1250_v17, %v500_v19 }
 0xfff   :  { %v502_v21 = vadd.f32 %v1250_v17, %v501_v20 }
0x1001   :  { %v506_v24 = vsel %vm505_vm5, %v1250_v17, %v502_v21 }
0x1002   :  { %v511_v27 = vsel %vm508_vm6, %v510_v25, %v506_v24 }
0x1003   :  { %v514_v29 = vmul.f32 %v511_v27, %v1447_v52 }
0x1057   :  { %v517_v26 = vpop.permute.xlu1 %516 }
0x1058   :  { %v519_v28 = vmul.f32 %v517_v26, %v511_v27 }
0x105a   :  { %521 = vrot.lane.b32.xlu0 %v519_v28, %s1336_s5 }
0x106d   :  { %v556_v32 = vpop.permute.xlu1 %555 }
0x10cc   :  { %v522_v30 = vpop.permute.xlu0 %521 }
0x10cd   :  { %v524_v31 = vadd.f32 %v522_v30, %v514_v29 }
0x10cf   :  { %v548_v33 = vmul.f32 %v545_v15, %v524_v31  ;;  %v1159_v31 = vld [vmem:[%s1594_s1 + $0x6] sm:$0x3] }
0x10d1   :  { %v1464_v34 = vadd.f32 %v556_v32, %v548_v33 }
0x10d3   :  { %1251 = vtanh.f32 %v1464_v34 }
0x10d9   :  { %v1252_v35 = vpop.eup %1251 }
0x10da   :  { %561 = vrot.lane.b32.xlu2 %v1252_v35, %s1335_s25 }
0x1134   :  { %v562_v40 = vpop.permute.xlu2 %561 }
0x1135   :  { %v1480_v41 = vmul.f32 %v562_v40, %v545_v15 }
0x1137   :  { %582 = vrot.lane.b32.xlu0 %v1480_v41, %s1336_s5 }
0x11a9   :  { %v583_v42 = vpop.permute.xlu0 %582 }
0x11aa   :  { %1154 = vmatmul.msk.f32.vlgmr.msrb.gmra.mxu3 %vm80_vm4, %v583_v42 }
0x122d   :  { %v603_v44 = vpop.f32.mrf.mxu3 }
0x122e   :  { %v606_v45 = vadd.f32 %v1153_v43, %v603_v44 }
0x1230   :  { %1253 = vtanh.f32 %v606_v45  ;;  %v1155_v47 = vmul.f32 -1.442695, %v606_v45 }
0x1232   :  { %1255 = vpow2.f32 %v1155_v47 }
0x1236   :  { %v1254_v46 = vpop.eup %1253 }
0x1237   :  { %629 = vrot.lane.b32.xlu1 %v1254_v46, %s1335_s25 }
0x1238   :  { %v1256_v48 = vpop.eup %1255 }
0x1239   :  { %v610_v49 = vadd.f32 1.0, %v1256_v48 }
0x123b   :  { %1257 = vrcp.f32 %v610_v49  ;;  %v622_v55 = vand.u32 2147483648, %v610_v49  ;;  %vm616_vm8 = vweird.f32 %v610_v49  ;;  %v620_v56 = vand.u32 2147483647, %v610_v49 }
0x123d   :  { %v623_v58 = vor.u32 1.1754944e-38, %v622_v55  ;;  %vm621_vm10 = vcmp.eq.f32.partialorder %v620_v56, 8.507059e+37 }
0x1241   :  { %v1258_v50 = vpop.eup %1257 }
0x1242   :  { %v612_v51 = vmul.f32 %v1258_v50, %v610_v49  ;;  %vm617_vm7 = vweird.f32 %v1258_v50 }
0x1243   :  { %vm618_vm9 = vmor %vm616_vm8, %vm617_vm7 }
0x1244   :  { %v613_v52 = vsub.f32 1.0, %v612_v51 }
0x1246   :  { %v614_v53 = vmul.f32 %v1258_v50, %v613_v52 }
0x1248   :  { %v615_v54 = vadd.f32 %v1258_v50, %v614_v53 }
0x124a   :  { %v619_v57 = vsel %vm618_vm9, %v1258_v50, %v615_v54 }
0x124b   :  { %v624_v60 = vsel %vm621_vm10, %v623_v58, %v619_v57  ;;  %v1162_v58 = vld [vmem:[%s1594_s1 + $0x8] sm:$0x3] }
0x124c   :  { %v627_v62 = vmul.f32 %v624_v60, %v1464_v34 }
0x12a9   :  { %v630_v59 = vpop.permute.xlu1 %629 }
0x12aa   :  { %v632_v61 = vmul.f32 %v630_v59, %v624_v60 }
0x12ac   :  { %634 = vrot.lane.b32.xlu2 %v632_v61, %s1336_s5 }
0x1306   :  { %v635_v63 = vpop.permute.xlu2 %634 }
0x1307   :  { %v637_v0 = vadd.f32 %v635_v63, %v627_v62 }
0x1309   :  { %1259 = vtanh.f32 %v637_v0 }
0x130f   :  { %v1260_v1 = vpop.eup %1259 }
0x1310   :  { %640 = vrot.lane.b32.xlu0 %v1260_v1, %s1335_s25 }
0x1382   :  { %v641_v2 = vpop.permute.xlu0 %640 }
0x1383   :  { %v1492_v3 = vmul.f32 %v641_v2, %v624_v60 }
0x1385   :  { %657 = vrot.lane.b32.xlu1 %v1492_v3, %s1336_s5 }
0x13f7   :  { %v658_v4 = vpop.permute.xlu1 %657 }
0x13f8   :  { %1157 = vmatmul.msk.f32.vlgmr.msra.gmra.mxu0 %vm80_vm4, %v658_v4 }
0x1475   :  { %v678_v6 = vpop.f32.mrf.mxu0 }
0x1476   :  { %v681_v7 = vadd.f32 %v1156_v5, %v678_v6 }
0x1478   :  { %1261 = vtanh.f32 %v681_v7  ;;  %v1158_v9 = vmul.f32 -1.442695, %v681_v7 }
0x147a   :  { %1263 = vpow2.f32 %v1158_v9 }
0x147e   :  { %v1262_v8 = vpop.eup %1261 }
0x147f   :  { %704 = vrot.lane.b32.xlu2 %v1262_v8, %s1335_s25 }
0x1480   :  { %v1264_v10 = vpop.eup %1263 }
0x1481   :  { %v685_v11 = vadd.f32 1.0, %v1264_v10 }
0x1483   :  { %1265 = vrcp.f32 %v685_v11  ;;  %v697_v17 = vand.u32 2147483648, %v685_v11  ;;  %vm691_vm12 = vweird.f32 %v685_v11  ;;  %v695_v18 = vand.u32 2147483647, %v685_v11 }
0x1485   :  { %v698_v20 = vor.u32 1.1754944e-38, %v697_v17  ;;  %vm696_vm14 = vcmp.eq.f32.partialorder %v695_v18, 8.507059e+37 }
0x1489   :  { %v1266_v12 = vpop.eup %1265 }
0x148a   :  { %v687_v13 = vmul.f32 %v1266_v12, %v685_v11  ;;  %vm692_vm11 = vweird.f32 %v1266_v12 }
0x148b   :  { %vm693_vm13 = vmor %vm691_vm12, %vm692_vm11 }
0x148c   :  { %v688_v14 = vsub.f32 1.0, %v687_v13 }
0x148e   :  { %v689_v15 = vmul.f32 %v1266_v12, %v688_v14 }
0x1490   :  { %v690_v16 = vadd.f32 %v1266_v12, %v689_v15 }
0x1492   :  { %v694_v19 = vsel %vm693_vm13, %v1266_v12, %v690_v16 }
0x1493   :  { %v699_v22 = vsel %vm696_vm14, %v698_v20, %v694_v19 }
0x1494   :  { %v702_v24 = vmul.f32 %v699_v22, %v637_v0 }
0x14d9   :  { %v705_v21 = vpop.permute.xlu2 %704 }
0x14da   :  { %v707_v23 = vmul.f32 %v705_v21, %v699_v22  ;;  %v1165_v21 = vld [vmem:[%s1594_s1 + $0xa] sm:$0x3] }
0x14dc   :  { %709 = vrot.lane.b32.xlu0 %v707_v23, %s1336_s5 }
0x154e   :  { %v710_v25 = vpop.permute.xlu0 %709 }
0x154f   :  { %v712_v26 = vadd.f32 %v710_v25, %v702_v24 }
0x1551   :  { %1267 = vtanh.f32 %v712_v26 }
0x1557   :  { %v1268_v27 = vpop.eup %1267 }
0x1558   :  { %715 = vrot.lane.b32.xlu1 %v1268_v27, %s1335_s25 }
0x15ca   :  { %v716_v28 = vpop.permute.xlu1 %715 }
0x15cb   :  { %v1503_v29 = vmul.f32 %v716_v28, %v699_v22 }
0x15cd   :  { %732 = vrot.lane.b32.xlu2 %v1503_v29, %s1336_s5 }
0x1627   :  { %v733_v30 = vpop.permute.xlu2 %732 }
0x1628   :  { %1160 = vmatmul.msk.f32.vlgmr.msra.gmra.mxu1 %vm80_vm4, %v733_v30 }
0x16a5   :  { %v753_v32 = vpop.f32.mrf.mxu1 }
0x16a6   :  { %v756_v33 = vadd.f32 %v1159_v31, %v753_v32 }
0x16a8   :  { %1269 = vtanh.f32 %v756_v33  ;;  %v1161_v35 = vmul.f32 -1.442695, %v756_v33 }
0x16aa   :  { %1271 = vpow2.f32 %v1161_v35 }
0x16ae   :  { %v1270_v34 = vpop.eup %1269 }
0x16af   :  { %779 = vrot.lane.b32.xlu0 %v1270_v34, %s1335_s25 }
0x16b0   :  { %v1272_v36 = vpop.eup %1271 }
0x16b1   :  { %v760_v37 = vadd.f32 1.0, %v1272_v36 }
0x16b3   :  { %1273 = vrcp.f32 %v760_v37  ;;  %v772_v44 = vand.u32 2147483648, %v760_v37  ;;  %vm766_vm0 = vweird.f32 %v760_v37  ;;  %v770_v45 = vand.u32 2147483647, %v760_v37 }
0x16b5   :  { %v773_v47 = vor.u32 1.1754944e-38, %v772_v44  ;;  %vm771_vm2 = vcmp.eq.f32.partialorder %v770_v45, 8.507059e+37 }
0x16b9   :  { %v1274_v38 = vpop.eup %1273 }
0x16ba   :  { %v762_v39 = vmul.f32 %v1274_v38, %v760_v37  ;;  %vm767_vm15 = vweird.f32 %v1274_v38 }
0x16bb   :  { %vm768_vm1 = vmor %vm766_vm0, %vm767_vm15  ;;  %vm573_vm0 = vcmask 254976  }
0x16bc   :  { %v763_v40 = vsub.f32 1.0, %v762_v39 }
0x16be   :  { %v764_v42 = vmul.f32 %v1274_v38, %v763_v40 }
0x16c0   :  { %v765_v43 = vadd.f32 %v1274_v38, %v764_v42 }
0x16c2   :  { %v769_v46 = vsel %vm768_vm1, %v1274_v38, %v765_v43 }
0x16c3   :  { %v774_v49 = vsel %vm771_vm2, %v773_v47, %v769_v46 }
0x16c4   :  { %v777_v51 = vmul.f32 %v774_v49, %v712_v26 }
0x1721   :  { %v780_v48 = vpop.permute.xlu0 %779 }
0x1722   :  { %v782_v50 = vmul.f32 %v780_v48, %v774_v49 }
0x1724   :  { %784 = vrot.lane.b32.xlu1 %v782_v50, %s1336_s5 }
0x1796   :  { %v785_v52 = vpop.permute.xlu1 %784 }
0x1797   :  { %v787_v53 = vadd.f32 %v785_v52, %v777_v51 }
0x1799   :  { %1275 = vtanh.f32 %v787_v53 }
0x179f   :  { %v1276_v54 = vpop.eup %1275 }
0x17a0   :  { %790 = vrot.lane.b32.xlu2 %v1276_v54, %s1335_s25 }
0x17fa   :  { %v791_v55 = vpop.permute.xlu2 %790 }
0x17fb   :  { %v1514_v56 = vmul.f32 %v791_v55, %v774_v49  ;;  %v1168_v49 = vld [vmem:[%s1594_s1 + $0xc] sm:$0x3] }
0x17fd   :  { %807 = vrot.lane.b32.xlu0 %v1514_v56, %s1336_s5 }
0x186f   :  { %v808_v57 = vpop.permute.xlu0 %807 }
0x1870   :  { %1163 = vmatmul.msk.f32.vlgmr.msra.gmra.mxu2 %vm80_vm4, %v808_v57 }
0x18f3   :  { %v828_v59 = vpop.f32.mrf.mxu2 }
0x18f4   :  { %v831_v60 = vadd.f32 %v1162_v58, %v828_v59 }
0x18f6   :  { %1277 = vtanh.f32 %v831_v60  ;;  %v1164_v62 = vmul.f32 -1.442695, %v831_v60 }
0x18f8   :  { %1279 = vpow2.f32 %v1164_v62 }
0x18fc   :  { %v1278_v61 = vpop.eup %1277 }
0x18fd   :  { %854 = vrot.lane.b32.xlu1 %v1278_v61, %s1335_s25 }
0x18fe   :  { %v1280_v63 = vpop.eup %1279 }
0x18ff   :  { %v835_v0 = vadd.f32 1.0, %v1280_v63 }
0x1901   :  { %1281 = vrcp.f32 %v835_v0  ;;  %v847_v7 = vand.u32 2147483648, %v835_v0  ;;  %vm841_vm5 = vweird.f32 %v835_v0  ;;  %v845_v8 = vand.u32 2147483647, %v835_v0 }
0x1903   :  { %v848_v10 = vor.u32 1.1754944e-38, %v847_v7  ;;  %vm846_vm7 = vcmp.eq.f32.partialorder %v845_v8, 8.507059e+37 }
0x1907   :  { %v1282_v1 = vpop.eup %1281 }
0x1908   :  { %v837_v2 = vmul.f32 %v1282_v1, %v835_v0  ;;  %vm842_vm3 = vweird.f32 %v1282_v1 }
0x1909   :  { %vm843_vm6 = vmor %vm841_vm5, %vm842_vm3 }
0x190a   :  { %v838_v4 = vsub.f32 1.0, %v837_v2 }
0x190c   :  { %v839_v5 = vmul.f32 %v1282_v1, %v838_v4 }
0x190e   :  { %v840_v6 = vadd.f32 %v1282_v1, %v839_v5 }
0x1910   :  { %v844_v9 = vsel %vm843_vm6, %v1282_v1, %v840_v6 }
0x1911   :  { %v849_v12 = vsel %vm846_vm7, %v848_v10, %v844_v9  ;;  %v1181_v10 = vld [vmem:[%s1597_s4] ss:$0 sm:$0xff] }
0x1912   :  { %v852_v14 = vmul.f32 %v849_v12, %v787_v53 }
0x196f   :  { %v855_v11 = vpop.permute.xlu1 %854 }
0x1970   :  { %v857_v13 = vmul.f32 %v855_v11, %v849_v12 }
0x1972   :  { %859 = vrot.lane.b32.xlu2 %v857_v13, %s1336_s5 }
0x19cc   :  { %v860_v15 = vpop.permute.xlu2 %859 }
0x19cd   :  { %v862_v16 = vadd.f32 %v860_v15, %v852_v14 }
0x19cf   :  { %1283 = vtanh.f32 %v862_v16 }
0x19d5   :  { %v1284_v17 = vpop.eup %1283 }
0x19d6   :  { %865 = vrot.lane.b32.xlu0 %v1284_v17, %s1335_s25 }
0x1a48   :  { %v866_v18 = vpop.permute.xlu0 %865 }
0x1a49   :  { %v1525_v19 = vmul.f32 %v866_v18, %v849_v12 }
0x1a4b   :  { %882 = vrot.lane.b32.xlu1 %v1525_v19, %s1336_s5 }
0x1abd   :  { %v883_v20 = vpop.permute.xlu1 %882 }
0x1abe   :  { %1166 = vmatmul.msk.f32.vlgmr.msra.gmra.mxu3 %vm80_vm4, %v883_v20 }
0x1b41   :  { %v903_v22 = vpop.f32.mrf.mxu3 }
0x1b42   :  { %v906_v23 = vadd.f32 %v1165_v21, %v903_v22 }
0x1b44   :  { %1285 = vtanh.f32 %v906_v23  ;;  %v1167_v25 = vmul.f32 -1.442695, %v906_v23 }
0x1b46   :  { %1287 = vpow2.f32 %v1167_v25 }
0x1b4a   :  { %v1286_v24 = vpop.eup %1285 }
0x1b4b   :  { %929 = vrot.lane.b32.xlu2 %v1286_v24, %s1335_s25 }
0x1b4c   :  { %v1288_v26 = vpop.eup %1287 }
0x1b4d   :  { %v910_v27 = vadd.f32 1.0, %v1288_v26 }
0x1b4f   :  { %1289 = vrcp.f32 %v910_v27  ;;  %v922_v34 = vand.u32 2147483648, %v910_v27  ;;  %vm916_vm9 = vweird.f32 %v910_v27  ;;  %v920_v35 = vand.u32 2147483647, %v910_v27 }
0x1b51   :  { %v923_v37 = vor.u32 1.1754944e-38, %v922_v34  ;;  %vm921_vm11 = vcmp.eq.f32.partialorder %v920_v35, 8.507059e+37 }
0x1b55   :  { %v1290_v28 = vpop.eup %1289 }
0x1b56   :  { %v912_v30 = vmul.f32 %v1290_v28, %v910_v27  ;;  %vm917_vm8 = vweird.f32 %v1290_v28 }
0x1b57   :  { %vm918_vm10 = vmor %vm916_vm9, %vm917_vm8 }
0x1b58   :  { %v913_v31 = vsub.f32 1.0, %v912_v30 }
0x1b5a   :  { %v914_v32 = vmul.f32 %v1290_v28, %v913_v31 }
0x1b5c   :  { %v915_v33 = vadd.f32 %v1290_v28, %v914_v32 }
0x1b5e   :  { %v919_v36 = vsel %vm918_vm10, %v1290_v28, %v915_v33 }
0x1b5f   :  { %v924_v39 = vsel %vm921_vm11, %v923_v37, %v919_v36 }
0x1b60   :  { %v927_v42 = vmul.f32 %v924_v39, %v862_v16 }
0x1ba5   :  { %v930_v38 = vpop.permute.xlu2 %929 }
0x1ba6   :  { %v932_v40 = vmul.f32 %v930_v38, %v924_v39 }
0x1ba8   :  { %934 = vrot.lane.b32.xlu0 %v932_v40, %s1336_s5 }
0x1c1a   :  { %v935_v43 = vpop.permute.xlu0 %934 }
0x1c1b   :  { %v937_v44 = vadd.f32 %v935_v43, %v927_v42 }
0x1c1d   :  { %1291 = vtanh.f32 %v937_v44 }
0x1c23   :  { %v1292_v45 = vpop.eup %1291 }
0x1c24   :  { %940 = vrot.lane.b32.xlu1 %v1292_v45, %s1335_s25 }
0x1c96   :  { %v941_v46 = vpop.permute.xlu1 %940 }
0x1c97   :  { %v1536_v47 = vmul.f32 %v941_v46, %v924_v39 }
0x1c99   :  { %957 = vrot.lane.b32.xlu2 %v1536_v47, %s1336_s5 }
0x1cf3   :  { %v958_v48 = vpop.permute.xlu2 %957 }
0x1cf4   :  { %1169 = vmatmul.msk.f32.vlgmr.msrb.gmra.mxu0 %vm80_vm4, %v958_v48 }
0x1d71   :  { %v978_v50 = vpop.f32.mrf.mxu0 }
0x1d72   :  { %v981_v51 = vadd.f32 %v1168_v49, %v978_v50 }
0x1d74   :  { %1293 = vtanh.f32 %v981_v51  ;;  %v1170_v53 = vmul.f32 -1.442695, %v981_v51 }
0x1d76   :  { %1295 = vpow2.f32 %v1170_v53 }
0x1d7a   :  { %v1294_v52 = vpop.eup %1293 }
0x1d7b   :  { %1004 = vrot.lane.b32.xlu0 %v1294_v52, %s1335_s25 }
0x1d7c   :  { %v1296_v54 = vpop.eup %1295 }
0x1d7d   :  { %v985_v55 = vadd.f32 1.0, %v1296_v54 }
0x1d7f   :  { %1297 = vrcp.f32 %v985_v55  ;;  %v997_v62 = vand.u32 2147483648, %v985_v55  ;;  %vm991_vm13 = vweird.f32 %v985_v55  ;;  %v995_v63 = vand.u32 2147483647, %v985_v55 }
0x1d81   :  { %v998_v1 = vor.u32 1.1754944e-38, %v997_v62  ;;  %vm996_vm15 = vcmp.eq.f32.partialorder %v995_v63, 8.507059e+37  ;;  %v525_v62 = vlaneseq }
0x1d83   :  { %v526_v63 = vand.u32 127, %v525_v62 }
0x1d85   :  { %v1298_v57 = vpop.eup %1297  ;;  %vm577_vm5 = vcmp.eq.s32.totalorder %v526_v63, 0  ;;  %vm652_vm6 = vcmp.eq.s32.totalorder %v526_v63, 1  ;;  %vm727_vm7 = vcmp.eq.s32.totalorder %v526_v63, 2  ;;  %vm802_vm8 = vcmp.eq.s32.totalorder %v526_v63, 3 }
0x1d86   :  { %v987_v58 = vmul.f32 %v1298_v57, %v985_v55  ;;  %vm992_vm12 = vweird.f32 %v1298_v57  ;;  %vm877_vm9 = vcmp.eq.s32.totalorder %v526_v63, 4  ;;  %vm952_vm10 = vcmp.eq.s32.totalorder %v526_v63, 5 }
0x1d87   :  { %vm993_vm14 = vmor %vm991_vm13, %vm992_vm12  ;;  %vm1027_vm11 = vcmp.eq.s32.totalorder %v526_v63, 6  ;;  %vm1102_vm12 = vcmp.eq.s32.totalorder %v526_v63, 7  ;;  %vm1112_vm13 = vcmask 58368  }
0x1d88   :  { %v988_v59 = vsub.f32 1.0, %v987_v58 }
0x1d8a   :  { %v989_v60 = vmul.f32 %v1298_v57, %v988_v59 }
0x1d8c   :  { %v990_v61 = vadd.f32 %v1298_v57, %v989_v60 }
0x1d8e   :  { %v994_v0 = vsel %vm993_vm14, %v1298_v57, %v990_v61 }
0x1d8f   :  { %v999_v4 = vsel %vm996_vm15, %v998_v1, %v994_v0 }
0x1d90   :  { %v1002_v6 = vmul.f32 %v999_v4, %v937_v44 }
0x1ded   :  { %v1005_v2 = vpop.permute.xlu0 %1004 }
0x1dee   :  { %v1007_v5 = vmul.f32 %v1005_v2, %v999_v4 }
0x1df0   :  { %1009 = vrot.lane.b32.xlu1 %v1007_v5, %s1336_s5 }
0x1e62   :  { %v1010_v7 = vpop.permute.xlu1 %1009 }
0x1e63   :  { %v1012_v8 = vadd.f32 %v1010_v7, %v1002_v6 }
0x1e65   :  { %1299 = vtanh.f32 %v1012_v8 }
0x1e6b   :  { %v1300_v9 = vpop.eup %1299 }
0x1e6c   :  { %1015 = vrot.lane.b32.xlu2 %v1300_v9, %s1335_s25 }
0x1e74   :  { %565 = vrot.lane.b32.xlu2 %v1181_v10, %s1337_s21 }
0x1ec6   :  { %v1016_v11 = vpop.permute.xlu2 %1015 }
0x1ec7   :  { %v1018_v12 = vmul.f32 %v1016_v11, %v999_v4  ;;  %v1182_v11 = vld [vmem:[#allocation2] ss:$0 sm:$0xff] }
0x1ec9   :  { %1032 = vrot.lane.b32.xlu0 %v1018_v12, %s1336_s5 }
0x1ece   :  { %v1551_v13 = vpop.permute.xlu2 %565 }
0x1ecf   :  { %v568_v14 = vmul.f32 %v1551_v13, %v1480_v41  ;;  %v644_v15 = vmul.f32 %v1492_v3, %v1551_v13  ;;  %v719_v16 = vmul.f32 %v1503_v29, %v1551_v13  ;;  %v1171_v3 = vld [vmem:[%s1594_s1 + $0xe] sm:$0x3]  ;;  %v794_v43 = vmul.f32 %v1514_v56, %v1551_v13  ;;  %s1339_s1 = smov [#allocation3]  }
0x1ed0   :  { %v869_v49 = vmul.f32 %v1525_v19, %v1551_v13  ;;  %v1019_v50 = vmul.f32 %v1018_v12, %v1551_v13  ;;  %v944_v53 = vmul.f32 %v1536_v47, %v1551_v13 }
0x1ed1   :  { %570 = vrot.lane.b32.xlu0 %v568_v14, %s1336_s5 }
0x1ed9   :  { %646 = vrot.lane.b32.xlu0 %v644_v15, %s1336_s5 }
0x1ee1   :  { %721 = vrot.lane.b32.xlu0 %v719_v16, %s1336_s5 }
0x1f3b   :  { %v1033_v17 = vpop.permute.xlu0 %1032 }
0x1f3c   :  { %1172 = vmatmul.msk.f32.vlgmr.msrb.gmra.mxu1 %vm80_vm4, %v1033_v17 }
0x1f43   :  { %v571_v18 = vpop.permute.xlu0 %570 }
0x1f44   :  { %v574_v24 = vsel %vm573_vm0, %v571_v18, 0.0 }
0x1f4b   :  { %v647_v20 = vpop.permute.xlu0 %646 }
0x1f4c   :  { %v649_v42 = vsel %vm573_vm0, %v647_v20, 0.0 }
0x1f53   :  { %v722_v21 = vpop.permute.xlu0 %721 }
0x1f54   :  { %v724_v41 = vsel %vm573_vm0, %v722_v21, 0.0 }
0x1f55   :  { %725 = vadd.xlane.f32.xlu0 %v724_v41 }
0x1fb9   :  { %v1053_v22 = vpop.f32.mrf.mxu1 }
0x1fba   :  { %v1056_v23 = vadd.f32 %v1171_v3, %v1053_v22 }
0x1fbc   :  { %1301 = vtanh.f32 %v1056_v23  ;;  %v1173_v25 = vmul.f32 -1.442695, %v1056_v23 }
0x1fbe   :  { %1303 = vpow2.f32 %v1173_v25 }
0x1fc2   :  { %v1302_v29 = vpop.eup %1301 }
0x1fc3   :  { %1079 = vrot.lane.b32.xlu1 %v1302_v29, %s1335_s25 }
0x1fc4   :  { %v1304_v26 = vpop.eup %1303 }
0x1fc5   :  { %v1060_v27 = vadd.f32 1.0, %v1304_v26 }
0x1fc7   :  { %1305 = vrcp.f32 %v1060_v27  ;;  %v1072_v34 = vand.u32 2147483648, %v1060_v27  ;;  %vm1066_vm1 = vweird.f32 %v1060_v27  ;;  %v1070_v35 = vand.u32 2147483647, %v1060_v27 }
0x1fc8   :  { %v726_v47 = vpop.xlane.xlu0 %725 }
0x1fc9   :  { %v1073_v37 = vor.u32 1.1754944e-38, %v1072_v34  ;;  %vm1071_vm3 = vcmp.eq.f32.partialorder %v1070_v35, 8.507059e+37 }
0x1fcd   :  { %v1306_v28 = vpop.eup %1305 }
0x1fce   :  { %v1062_v30 = vmul.f32 %v1306_v28, %v1060_v27  ;;  %vm1067_vm4 = vweird.f32 %v1306_v28 }
0x1fcf   :  { %vm1068_vm2 = vmor %vm1066_vm1, %vm1067_vm4 }
0x1fd0   :  { %v1063_v31 = vsub.f32 1.0, %v1062_v30 }
0x1fd2   :  { %v1064_v32 = vmul.f32 %v1306_v28, %v1063_v31 }
0x1fd4   :  { %v1065_v33 = vadd.f32 %v1306_v28, %v1064_v32 }
0x1fd6   :  { %v1069_v36 = vsel %vm1068_vm2, %v1306_v28, %v1065_v33 }
0x1fd7   :  { %v1074_v39 = vsel %vm1071_vm3, %v1073_v37, %v1069_v36 }
0x1fd8   :  { %v1077_v44 = vmul.f32 %v1074_v39, %v1012_v8  ;;  %v1338_v8 = vmov 0  }
0x1fd9   :  { %1179 = vset.pattern.permute.xlu2 %v1338_v8  ;;  %1180 = vset.pattern.permute.xlu0 %v1338_v8 }
0x1fed   :  { %575 = vadd.xlane.f32.xlu1 %v574_v24 }
0x2035   :  { %v1080_v38 = vpop.permute.xlu1 %1079 }
0x2036   :  { %v1082_v40 = vmul.f32 %v1080_v38, %v1074_v39 }
0x2038   :  { %1084 = vrot.lane.b32.xlu2 %v1082_v40, %s1336_s5 }
0x2060   :  { %v576_v54 = vpop.xlane.xlu1 %575 }
0x2061   :  { %650 = vadd.xlane.f32.xlu2 %v649_v42  ;;  %v578_v0 = vsel %vm577_vm5, %v576_v54, 0.0 }
0x2079   :  { %796 = vrot.lane.b32.xlu2 %v794_v43, %s1336_s5 }
0x2092   :  { %v1085_v45 = vpop.permute.xlu2 %1084 }
0x2093   :  { %v1087_v46 = vadd.f32 %v1085_v45, %v1077_v44 }
0x2095   :  { %1307 = vtanh.f32 %v1087_v46 }
0x209b   :  { %v1308_v48 = vpop.eup %1307 }
0x209c   :  { %1090 = vrot.lane.b32.xlu1 %v1308_v48, %s1335_s25  ;;  %s1119_s25 = sshll.u32 %s1339_s1, 4  ;;  %s1120_s25 = int_to_ptr.vmem [resolvable:$true] %s1119_s25 }
0x20a4   :  { %871 = vrot.lane.b32.xlu1 %v869_v49, %s1336_s5 }
0x20ac   :  { %1021 = vrot.lane.b32.xlu1 %v1019_v50, %s1336_s5 }
0x20d4   :  { %v651_v51 = vpop.xlane.xlu2 %650 }
0x20d5   :  { %v653_v1 = vsel %vm652_vm6, %v651_v51, %v578_v0 }
0x20d6   :  { %v728_v2 = vsel %vm727_vm7, %v726_v47, %v653_v1 }
0x20dc   :  { %v797_v56 = vpop.permute.xlu2 %796 }
0x20dd   :  { %v799_v52 = vsel %vm573_vm0, %v797_v56, 0.0 }
0x20de   :  { %800 = vadd.xlane.f32.xlu0 %v799_v52 }
0x20f2   :  { %946 = vrot.lane.b32.xlu0 %v944_v53, %s1336_s5 }
0x210e   :  { %v1091_v55 = vpop.permute.xlu1 %1090 }
0x210f   :  { %v1093_v57 = vmul.f32 %v1091_v55, %v1074_v39 }
0x2111   :  { %v1094_v19 = vmul.f32 %v1093_v57, %v1551_v13 }
0x2113   :  { %1096 = vrot.lane.b32.xlu1 %v1094_v19, %s1336_s5 }
0x2116   :  { %v872_v58 = vpop.permute.xlu1 %871 }
0x2117   :  { %v874_v59 = vsel %vm573_vm0, %v872_v58, 0.0 }
0x2118   :  { %875 = vadd.xlane.f32.xlu2 %v874_v59 }
0x211e   :  { %v1022_v60 = vpop.permute.xlu1 %1021 }
0x211f   :  { %v1024_v61 = vsel %vm573_vm0, %v1022_v60, 0.0 }
0x2120   :  { %1025 = vadd.xlane.f32.xlu0 %v1024_v61 }
0x2151   :  { %v801_v4 = vpop.xlane.xlu0 %800 }
0x2152   :  { %v803_v5 = vsel %vm802_vm8, %v801_v4, %v728_v2 }
0x2164   :  { %v947_v6 = vpop.permute.xlu0 %946 }
0x2165   :  { %v949_v7 = vsel %vm573_vm0, %v947_v6, 0.0 }
0x2166   :  { %950 = vadd.xlane.f32.xlu1 %v949_v7 }
0x2185   :  { %v1097_v9 = vpop.permute.xlu1 %1096 }
0x2186   :  { %v1099_v10 = vsel %vm573_vm0, %v1097_v9, 0.0 }
0x2187   :  { %1100 = vadd.xlane.f32.xlu2 %v1099_v10 }
0x218b   :  { %v876_v12 = vpop.xlane.xlu2 %875 }
0x218c   :  { %v878_v15 = vsel %vm877_vm9, %v876_v12, %v803_v5 }
0x2193   :  { %v1026_v17 = vpop.xlane.xlu0 %1025 }
0x219f   :  { %1108 = vperm.xlu2 %1179, %v1182_v11  }
0x21d9   :  { %v951_v14 = vpop.xlane.xlu1 %950 }
0x21da   :  { %v953_v16 = vsel %vm952_vm10, %v951_v14, %v878_v15 }
0x21db   :  { %v1028_v18 = vsel %vm1027_vm11, %v1026_v17, %v953_v16 }
0x21fa   :  { %v1101_v13 = vpop.xlane.xlu2 %1100 }
0x21fb   :  { %v1103_v20 = vsel %vm1102_vm12, %v1101_v13, %v1028_v18 }
0x2202   :  { %v1109_v21 = vpop.permute.xlu2 %1108 }
0x2203   :  { %v1111_v41 = vadd.f32 %v1109_v21, %v1103_v20 }
0x2205   :  { %1113 = vst.msk [vmem:[#allocation3] sm:$0x3] %vm1112_vm13, %v1111_v41 }
0x2206   :  { %1124 = dma.vmem_to_hbm [thread:$0]  %s1120_s25, 32, %s1122_s24, [#allocation4]  }
0x2207   :  { %1333 = dma.done.wait [#allocation4], 32  }
0x2208   :  { %1334 = vsyncadd [#allocation4], 4294967264 }
0x2209   :  { %1129 = vsyncpa [#allocation4], 1 }

</bundles_post_ra>
